<compile_context>
chip_gen: v5e
topology: v5e:2x2
jax: 0.10.0
libtpu: 0.0.40
codegen_flags: <defaults>
</compile_context>

<pallas_src>
import jax
import jax.numpy as jnp
from jax.experimental import pallas as pl
from jax.experimental.pallas import tpu as pltpu


def _a8(n):
    return ((n + 7) // 8) * 8


def pack_params(params):
    """One-time parameter prep: fold, transpose, and pack into one slab."""
    f32 = jnp.float32
    in_w = jnp.asarray(params["in_proj_w"], f32)      # (3E, E)
    in_b = jnp.asarray(params["in_proj_b"], f32)      # (3E,)
    wo = jnp.asarray(params["out_proj_w"], f32)       # (E, E)
    bo = jnp.asarray(params["out_proj_b"], f32)       # (E,)
    wih0 = jnp.asarray(params["weight_ih_l0"], f32)   # (4H, E)
    whh0 = jnp.asarray(params["weight_hh_l0"], f32)   # (4H, H)
    b0 = jnp.asarray(params["bias_ih_l0"], f32) + jnp.asarray(params["bias_hh_l0"], f32)
    wih1 = jnp.asarray(params["weight_ih_l1"], f32)   # (4H, H)
    whh1 = jnp.asarray(params["weight_hh_l1"], f32)   # (4H, H)
    b1 = jnp.asarray(params["bias_ih_l1"], f32) + jnp.asarray(params["bias_hh_l1"], f32)
    wlin = jnp.asarray(params["lin_w"], f32)           # (O, H)
    blin = jnp.asarray(params["lin_b"], f32)           # (O,)

    E = in_w.shape[1]
    H = whh0.shape[1]
    O = wlin.shape[0]
    G = 4 * H                                          # slab width (lane-dense)
    assert G >= E and G >= O and G >= 1

    # Fold out_proj into the layer-0 input-side matmul (exact transformation).
    wfold = wo.T @ wih0.T                              # (E, 4H)
    bfold = bo @ wih0.T + b0                           # (4H,)
    # Stacked layer-1 weights for the fused (1,2H)@(2H,4H) per-step matmul.
    w1cat = jnp.concatenate([wih1.T, whh1.T], axis=0)  # (2H, 4H)

    wqt = in_w[:E, :].T                                # (E, E)
    bq = in_b[:E]                                      # (E,)
    wkv = in_w[E:, :]                                  # (2E, E)
    bkv = in_b[E:]                                     # (2E,)

    rows = {}
    r = 0
    for name, nrows in (("wfold", E), ("bfold", 1), ("whh0", H), ("w1cat", 2 * H),
                        ("b1", 1), ("wlin", H), ("blin", 1),
                        ("wqt", E), ("bq", 1), ("wkv", 2 * E), ("bkv", 2 * E)):
        rows[name] = r
        r += _a8(nrows)
    total = _a8(r)

    slab = jnp.zeros((total, G), f32)

    def setblk(s, name, arr):
        arr = jnp.atleast_2d(arr)
        return s.at[rows[name]:rows[name] + arr.shape[0], 0:arr.shape[1]].set(arr)

    slab = setblk(slab, "wfold", wfold)
    slab = setblk(slab, "bfold", bfold[None, :])
    slab = setblk(slab, "whh0", whh0.T)                # (H, 4H)
    slab = setblk(slab, "w1cat", w1cat)                # (2H, 4H)
    slab = setblk(slab, "b1", b1[None, :])
    slab = setblk(slab, "wlin", wlin.T)                # (H, O) into (H, 4H) block
    slab = setblk(slab, "blin", blin[None, :])
    slab = setblk(slab, "wqt", wqt)
    slab = setblk(slab, "bq", bq[None, :])
    slab = setblk(slab, "wkv", wkv)
    slab = setblk(slab, "bkv", bkv[:, None])           # column vector
    return slab, (E, H, O), rows


def make_kernel(L, E, H, O, rows):
    G = 4 * H
    RX = 0
    RXT = _a8(L)

    def kernel(xs_ref, p_ref, out_ref):
        f32 = jnp.float32
        x = xs_ref[RX:RX + L, 0:E]                     # (L, E)
        xt = xs_ref[RXT:RXT + E, 0:L]                  # (E, L)

        wqt = p_ref[rows["wqt"]:rows["wqt"] + E, 0:E]
        bq = p_ref[rows["bq"]:rows["bq"] + 1, 0:E]
        wkv = p_ref[rows["wkv"]:rows["wkv"] + 2 * E, 0:E]
        bkv = p_ref[rows["bkv"]:rows["bkv"] + 2 * E, 0:1]
        wfold = p_ref[rows["wfold"]:rows["wfold"] + E, :]      # (E, 4H)
        bfold = p_ref[rows["bfold"]:rows["bfold"] + 1, :]      # (1, 4H)

        # ---- attention (num_heads = E -> head_dim = 1, scale = 1) ----
        q = jnp.dot(x, wqt, preferred_element_type=f32) + bq           # (L, E)
        kvt = jnp.dot(wkv, xt, preferred_element_type=f32) + bkv       # (2E, L)

        # gx0 accumulates the layer-0 input-side gate pre-activations directly
        # (out_proj folded into Wfold / bfold).
        gx0 = jnp.zeros((L, G), f32) + bfold
        for h in range(E):                       # static unroll over heads (VPU/XLU)
            q_col = q[:, h:h + 1]                # (L, 1)
            k_row = kvt[h:h + 1, :]              # (1, L)
            v_row = kvt[E + h:E + h + 1, :]      # (1, L)
            s = q_col * k_row                    # (L, L) outer product
            s = s - jnp.max(s, axis=-1, keepdims=True)
            u = jnp.exp(s)
            num = jnp.sum(u * v_row, axis=-1, keepdims=True)           # (L, 1)
            den = jnp.sum(u, axis=-1, keepdims=True)                   # (L, 1)
            o_col = num / den                    # deferred normalization (exact)
            gx0 = gx0 + o_col * wfold[h:h + 1, :]

        # ---- interleaved 2-layer LSTM (layer-0 step t, layer-1 step t-1) ----
        whh0 = p_ref[rows["whh0"]:rows["whh0"] + H, :]          # (H, 4H)
        w1cat = p_ref[rows["w1cat"]:rows["w1cat"] + 2 * H, :]   # (2H, 4H)
        b1 = p_ref[rows["b1"]:rows["b1"] + 1, :]                # (1, 4H)

        row_ids = jax.lax.broadcasted_iota(jnp.int32, (L, H), 0)

        def cell(gates, c):
            sig = jax.nn.sigmoid(gates)          # full lane-dense 4H gate vector
            th = jnp.tanh(gates)
            i_g = sig[:, 0:H]
            f_g = sig[:, H:2 * H]
            g_g = th[:, 2 * H:3 * H]
            o_g = sig[:, 3 * H:4 * H]
            c_new = f_g * c + i_g * g_g
            h_new = o_g * jnp.tanh(c_new)
            return h_new, c_new

        h0 = jnp.zeros((1, H), f32)
        c0 = jnp.zeros((1, H), f32)
        h1 = jnp.zeros((1, H), f32)
        c1 = jnp.zeros((1, H), f32)
        seq1 = jnp.zeros((L, H), f32)

        for t in range(L + 1):                   # static unroll; two indep chains/iter
            gates0 = None
            if t < L:
                # layer-0 step t (uses h0 from step t-1)
                gates0 = gx0[t:t + 1, :] + jnp.dot(h0, whh0, preferred_element_type=f32)
            if t >= 1:
                # layer-1 step t-1: seq0_{t-1} == current h0, h1 == h1_{t-2}
                x1 = jnp.concatenate([h0, h1], axis=1)                 # (1, 2H)
                gates1 = b1 + jnp.dot(x1, w1cat, preferred_element_type=f32)
                h1, c1 = cell(gates1, c1)
                seq1 = jnp.where(row_ids == (t - 1), h1, seq1)
            if t < L:
                h0, c0 = cell(gates0, c0)

        # ---- final Linear(H -> O) ----
        wlin = p_ref[rows["wlin"]:rows["wlin"] + H, :]          # (H, 4H), zero-padded
        blin = p_ref[rows["blin"]:rows["blin"] + 1, :]          # (1, 4H), zero-padded
        res = jnp.dot(seq1, wlin, preferred_element_type=f32) + blin   # (L, 4H)
        out_ref[...] = res[:, 0:O]

    return kernel


def build_forward(params, seq_len):
    """Returns a jitted forward(X) -> (L, out_size); params prepped once."""
    slab, (E, H, O), rows = pack_params(params)
    L = seq_len
    kernel = make_kernel(L, E, H, O, rows)
    RXT = _a8(L)
    x_rows = RXT + _a8(E)
    xw = max(L, E)
    vmem = pl.BlockSpec(memory_space=pltpu.MemorySpace.VMEM)

    @jax.jit
    def forward(X):
        x_last = X[:, -1, :].astype(jnp.float32)        # (L, E) -- only batch element returned
        xs = jnp.zeros((x_rows, xw), jnp.float32)
        xs = xs.at[0:L, 0:E].set(x_last)
        xs = xs.at[RXT:RXT + E, 0:L].set(x_last.T)
        return pl.pallas_call(
            kernel,
            out_shape=jax.ShapeDtypeStruct((L, O), jnp.float32),
            in_specs=[vmem, vmem],
            out_specs=vmem,
        )(xs, slab)

    return forward


def reference_forward(X, params):
    """Pure-JAX reference matching torch semantics (for verification)."""
    qkv = jnp.einsum("lne,fe->lnf", X, params["in_proj_w"]) + params["in_proj_b"]
    q, k, v = jnp.split(qkv, 3, axis=-1)
    s = jnp.einsum("lnh,mnh->nhlm", q, k)                 # head_dim = 1 -> scale 1.0
    p = jax.nn.softmax(s, axis=-1)
    o = jnp.einsum("nhlm,mnh->lnh", p, v)
    attn = jnp.einsum("lnh,eh->lne", o, params["out_proj_w"]) + params["out_proj_b"]

    def lstm_layer(inp, wih, whh, bih, bhh):
        Hh = whh.shape[1]

        def step(carry, x_t):
            h, c = carry
            g = x_t @ wih.T + h @ whh.T + bih + bhh
            i = jax.nn.sigmoid(g[:, 0:Hh])
            f = jax.nn.sigmoid(g[:, Hh:2 * Hh])
            gg = jnp.tanh(g[:, 2 * Hh:3 * Hh])
            og = jax.nn.sigmoid(g[:, 3 * Hh:4 * Hh])
            c = f * c + i * gg
            h = og * jnp.tanh(c)
            return (h, c), h

        nb = inp.shape[1]
        init = (jnp.zeros((nb, Hh), jnp.float32), jnp.zeros((nb, Hh), jnp.float32))
        _, outs = jax.lax.scan(step, init, inp)
        return outs

    s0 = lstm_layer(attn, params["weight_ih_l0"], params["weight_hh_l0"],
                    params["bias_ih_l0"], params["bias_hh_l0"])
    s1 = lstm_layer(s0, params["weight_ih_l1"], params["weight_hh_l1"],
                    params["bias_ih_l1"], params["bias_hh_l1"])
    y = s1 @ params["lin_w"].T + params["lin_b"]
    return y[:, -1, :]


if __name__ == "__main__":
    # embed_dim=4, out_size=6, hidden_size=32, n_layers=2, seq=8, batch=2.
    L, N, E, H, O = 8, 2, 4, 32, 6
    key = jax.random.PRNGKey(0)
    ks = jax.random.split(key, 16)

    def rnd(k, shape, scale=0.2):
        return (scale * jax.random.normal(k, shape)).astype(jnp.float32)

    params = {
        "in_proj_w":    rnd(ks[0], (3 * E, E)),
        "in_proj_b":    rnd(ks[1], (3 * E,)),
        "out_proj_w":   rnd(ks[2], (E, E)),
        "out_proj_b":   rnd(ks[3], (E,)),
        "weight_ih_l0": rnd(ks[4], (4 * H, E)),
        "weight_hh_l0": rnd(ks[5], (4 * H, H)),
        "bias_ih_l0":   rnd(ks[6], (4 * H,)),
        "bias_hh_l0":   rnd(ks[7], (4 * H,)),
        "weight_ih_l1": rnd(ks[8], (4 * H, H)),
        "weight_hh_l1": rnd(ks[9], (4 * H, H)),
        "bias_ih_l1":   rnd(ks[10], (4 * H,)),
        "bias_hh_l1":   rnd(ks[11], (4 * H,)),
        "lin_w":        rnd(ks[12], (O, H)),
        "lin_b":        rnd(ks[13], (O,)),
    }
    X = jax.random.normal(ks[14], (L, N, E), dtype=jnp.float32)

    forward = build_forward(params, seq_len=L)
    out = jax.block_until_ready(forward(X))
    ref = jax.block_until_ready(reference_forward(X, params))
    assert out.shape == (L, O), out.shape
    if not jnp.allclose(out, ref, atol=1e-4, rtol=1e-4):
        raise AssertionError(
            f"kernel/reference mismatch, max abs err = {jnp.max(jnp.abs(out - ref))}")
    print("KERNEL_OK")
</pallas_src>

<mosaic_0001>
module attributes {stable_mosaic.version = 11 : i64} {
  func.func @kernel(%arg0: memref<16x8xf32, #tpu.memory_space<vmem>>, %arg1: memref<192x128xf32, #tpu.memory_space<vmem>>, %arg2: memref<8x6xf32, #tpu.memory_space<vmem>>) attributes {dimension_semantics = [], scalar_prefetch = 0 : i64, scratch_operands = 0 : i64, tpu.core_type = #tpu.core_type<tc>} {
    %c0 = arith.constant 0 : index
    %c0_0 = arith.constant 0 : index
    %0 = vector.load %arg0[%c0, %c0_0] : memref<16x8xf32, #tpu.memory_space<vmem>>, vector<8x4xf32>
    %c8 = arith.constant 8 : index
    %c0_1 = arith.constant 0 : index
    %1 = vector.load %arg0[%c8, %c0_1] : memref<16x8xf32, #tpu.memory_space<vmem>>, vector<4x8xf32>
    %c160 = arith.constant 160 : index
    %c0_2 = arith.constant 0 : index
    %2 = vector.load %arg1[%c160, %c0_2] : memref<192x128xf32, #tpu.memory_space<vmem>>, vector<4x4xf32>
    %c168 = arith.constant 168 : index
    %c0_3 = arith.constant 0 : index
    %3 = vector.load %arg1[%c168, %c0_3] : memref<192x128xf32, #tpu.memory_space<vmem>>, vector<1x4xf32>
    %c176 = arith.constant 176 : index
    %c0_4 = arith.constant 0 : index
    %4 = vector.load %arg1[%c176, %c0_4] : memref<192x128xf32, #tpu.memory_space<vmem>>, vector<8x4xf32>
    %c184 = arith.constant 184 : index
    %c0_5 = arith.constant 0 : index
    %5 = vector.load %arg1[%c184, %c0_5] : memref<192x128xf32, #tpu.memory_space<vmem>>, vector<8x1xf32>
    %c0_6 = arith.constant 0 : index
    %c0_7 = arith.constant 0 : index
    %6 = vector.load %arg1[%c0_6, %c0_7] : memref<192x128xf32, #tpu.memory_space<vmem>>, vector<4x128xf32>
    %c8_8 = arith.constant 8 : index
    %c0_9 = arith.constant 0 : index
    %7 = vector.load %arg1[%c8_8, %c0_9] : memref<192x128xf32, #tpu.memory_space<vmem>>, vector<1x128xf32>
    %cst = arith.constant dense<0.000000e+00> : vector<8x4xf32>
    %8 = tpu.matmul %0, %2, %cst {dimension_numbers = #tpu.dot_dimension_numbers<[1], [0], [0], [1], [0, 0, 1, 1], [], []>} : vector<8x4xf32>, vector<4x4xf32>, vector<8x4xf32> -> vector<8x4xf32>
    %9 = vector.broadcast %3 : vector<1x4xf32> to vector<8x4xf32>
    %10 = arith.addf %8, %9 : vector<8x4xf32>
    %cst_10 = arith.constant dense<0.000000e+00> : vector<8x8xf32>
    %11 = tpu.matmul %4, %1, %cst_10 {dimension_numbers = #tpu.dot_dimension_numbers<[1], [0], [0], [1], [0, 0, 1, 1], [], []>} : vector<8x4xf32>, vector<4x8xf32>, vector<8x8xf32> -> vector<8x8xf32>
    %12 = vector.broadcast %5 : vector<8x1xf32> to vector<8x8xf32>
    %13 = arith.addf %11, %12 : vector<8x8xf32>
    %cst_11 = arith.constant 0.000000e+00 : f32
    %14 = vector.broadcast %cst_11 : f32 to vector<8x128xf32>
    %15 = vector.broadcast %7 : vector<1x128xf32> to vector<8x128xf32>
    %16 = arith.addf %14, %15 : vector<8x128xf32>
    %17 = vector.extract_strided_slice %10 {offsets = [0, 0], sizes = [8, 1], strides = [1, 1]} : vector<8x4xf32> to vector<8x1xf32>
    %18 = vector.extract_strided_slice %13 {offsets = [0, 0], sizes = [1, 8], strides = [1, 1]} : vector<8x8xf32> to vector<1x8xf32>
    %19 = vector.extract_strided_slice %13 {offsets = [4, 0], sizes = [1, 8], strides = [1, 1]} : vector<8x8xf32> to vector<1x8xf32>
    %20 = vector.broadcast %17 : vector<8x1xf32> to vector<8x8xf32>
    %21 = vector.broadcast %18 : vector<1x8xf32> to vector<8x8xf32>
    %22 = arith.mulf %20, %21 : vector<8x8xf32>
    %cst_12 = arith.constant dense<0xFF800000> : vector<8xf32>
    %23 = vector.multi_reduction <maximumf>, %22, %cst_12 [1] : vector<8x8xf32> to vector<8xf32>
    %24 = vector.shape_cast %23 : vector<8xf32> to vector<8x1xf32>
    %25 = vector.broadcast %24 : vector<8x1xf32> to vector<8x8xf32>
    %26 = arith.subf %22, %25 : vector<8x8xf32>
    %27 = math.exp %26 : vector<8x8xf32>
    %28 = vector.broadcast %19 : vector<1x8xf32> to vector<8x8xf32>
    %29 = arith.mulf %27, %28 : vector<8x8xf32>
    %cst_13 = arith.constant dense<0.000000e+00> : vector<8xf32>
    %30 = vector.multi_reduction <add>, %29, %cst_13 [1] : vector<8x8xf32> to vector<8xf32>
    %31 = vector.shape_cast %30 : vector<8xf32> to vector<8x1xf32>
    %cst_14 = arith.constant dense<0.000000e+00> : vector<8xf32>
    %32 = vector.multi_reduction <add>, %27, %cst_14 [1] : vector<8x8xf32> to vector<8xf32>
    %33 = vector.shape_cast %32 : vector<8xf32> to vector<8x1xf32>
    %34 = arith.divf %31, %33 : vector<8x1xf32>
    %35 = vector.extract_strided_slice %6 {offsets = [0, 0], sizes = [1, 128], strides = [1, 1]} : vector<4x128xf32> to vector<1x128xf32>
    %36 = vector.broadcast %34 : vector<8x1xf32> to vector<8x128xf32>
    %37 = vector.broadcast %35 : vector<1x128xf32> to vector<8x128xf32>
    %38 = arith.mulf %36, %37 : vector<8x128xf32>
    %39 = arith.addf %16, %38 : vector<8x128xf32>
    %40 = vector.extract_strided_slice %10 {offsets = [0, 1], sizes = [8, 1], strides = [1, 1]} : vector<8x4xf32> to vector<8x1xf32>
    %41 = vector.extract_strided_slice %13 {offsets = [1, 0], sizes = [1, 8], strides = [1, 1]} : vector<8x8xf32> to vector<1x8xf32>
    %42 = vector.extract_strided_slice %13 {offsets = [5, 0], sizes = [1, 8], strides = [1, 1]} : vector<8x8xf32> to vector<1x8xf32>
    %43 = vector.broadcast %40 : vector<8x1xf32> to vector<8x8xf32>
    %44 = vector.broadcast %41 : vector<1x8xf32> to vector<8x8xf32>
    %45 = arith.mulf %43, %44 : vector<8x8xf32>
    %cst_15 = arith.constant dense<0xFF800000> : vector<8xf32>
    %46 = vector.multi_reduction <maximumf>, %45, %cst_15 [1] : vector<8x8xf32> to vector<8xf32>
    %47 = vector.shape_cast %46 : vector<8xf32> to vector<8x1xf32>
    %48 = vector.broadcast %47 : vector<8x1xf32> to vector<8x8xf32>
    %49 = arith.subf %45, %48 : vector<8x8xf32>
    %50 = math.exp %49 : vector<8x8xf32>
    %51 = vector.broadcast %42 : vector<1x8xf32> to vector<8x8xf32>
    %52 = arith.mulf %50, %51 : vector<8x8xf32>
    %cst_16 = arith.constant dense<0.000000e+00> : vector<8xf32>
    %53 = vector.multi_reduction <add>, %52, %cst_16 [1] : vector<8x8xf32> to vector<8xf32>
    %54 = vector.shape_cast %53 : vector<8xf32> to vector<8x1xf32>
    %cst_17 = arith.constant dense<0.000000e+00> : vector<8xf32>
    %55 = vector.multi_reduction <add>, %50, %cst_17 [1] : vector<8x8xf32> to vector<8xf32>
    %56 = vector.shape_cast %55 : vector<8xf32> to vector<8x1xf32>
    %57 = arith.divf %54, %56 : vector<8x1xf32>
    %58 = vector.extract_strided_slice %6 {offsets = [1, 0], sizes = [1, 128], strides = [1, 1]} : vector<4x128xf32> to vector<1x128xf32>
    %59 = vector.broadcast %57 : vector<8x1xf32> to vector<8x128xf32>
    %60 = vector.broadcast %58 : vector<1x128xf32> to vector<8x128xf32>
    %61 = arith.mulf %59, %60 : vector<8x128xf32>
    %62 = arith.addf %39, %61 : vector<8x128xf32>
    %63 = vector.extract_strided_slice %10 {offsets = [0, 2], sizes = [8, 1], strides = [1, 1]} : vector<8x4xf32> to vector<8x1xf32>
    %64 = vector.extract_strided_slice %13 {offsets = [2, 0], sizes = [1, 8], strides = [1, 1]} : vector<8x8xf32> to vector<1x8xf32>
    %65 = vector.extract_strided_slice %13 {offsets = [6, 0], sizes = [1, 8], strides = [1, 1]} : vector<8x8xf32> to vector<1x8xf32>
    %66 = vector.broadcast %63 : vector<8x1xf32> to vector<8x8xf32>
    %67 = vector.broadcast %64 : vector<1x8xf32> to vector<8x8xf32>
    %68 = arith.mulf %66, %67 : vector<8x8xf32>
    %cst_18 = arith.constant dense<0xFF800000> : vector<8xf32>
    %69 = vector.multi_reduction <maximumf>, %68, %cst_18 [1] : vector<8x8xf32> to vector<8xf32>
    %70 = vector.shape_cast %69 : vector<8xf32> to vector<8x1xf32>
    %71 = vector.broadcast %70 : vector<8x1xf32> to vector<8x8xf32>
    %72 = arith.subf %68, %71 : vector<8x8xf32>
    %73 = math.exp %72 : vector<8x8xf32>
    %74 = vector.broadcast %65 : vector<1x8xf32> to vector<8x8xf32>
    %75 = arith.mulf %73, %74 : vector<8x8xf32>
    %cst_19 = arith.constant dense<0.000000e+00> : vector<8xf32>
    %76 = vector.multi_reduction <add>, %75, %cst_19 [1] : vector<8x8xf32> to vector<8xf32>
    %77 = vector.shape_cast %76 : vector<8xf32> to vector<8x1xf32>
    %cst_20 = arith.constant dense<0.000000e+00> : vector<8xf32>
    %78 = vector.multi_reduction <add>, %73, %cst_20 [1] : vector<8x8xf32> to vector<8xf32>
    %79 = vector.shape_cast %78 : vector<8xf32> to vector<8x1xf32>
    %80 = arith.divf %77, %79 : vector<8x1xf32>
    %81 = vector.extract_strided_slice %6 {offsets = [2, 0], sizes = [1, 128], strides = [1, 1]} : vector<4x128xf32> to vector<1x128xf32>
    %82 = vector.broadcast %80 : vector<8x1xf32> to vector<8x128xf32>
    %83 = vector.broadcast %81 : vector<1x128xf32> to vector<8x128xf32>
    %84 = arith.mulf %82, %83 : vector<8x128xf32>
    %85 = arith.addf %62, %84 : vector<8x128xf32>
    %86 = vector.extract_strided_slice %10 {offsets = [0, 3], sizes = [8, 1], strides = [1, 1]} : vector<8x4xf32> to vector<8x1xf32>
    %87 = vector.extract_strided_slice %13 {offsets = [3, 0], sizes = [1, 8], strides = [1, 1]} : vector<8x8xf32> to vector<1x8xf32>
    %88 = vector.extract_strided_slice %13 {offsets = [7, 0], sizes = [1, 8], strides = [1, 1]} : vector<8x8xf32> to vector<1x8xf32>
    %89 = vector.broadcast %86 : vector<8x1xf32> to vector<8x8xf32>
    %90 = vector.broadcast %87 : vector<1x8xf32> to vector<8x8xf32>
    %91 = arith.mulf %89, %90 : vector<8x8xf32>
    %cst_21 = arith.constant dense<0xFF800000> : vector<8xf32>
    %92 = vector.multi_reduction <maximumf>, %91, %cst_21 [1] : vector<8x8xf32> to vector<8xf32>
    %93 = vector.shape_cast %92 : vector<8xf32> to vector<8x1xf32>
    %94 = vector.broadcast %93 : vector<8x1xf32> to vector<8x8xf32>
    %95 = arith.subf %91, %94 : vector<8x8xf32>
    %96 = math.exp %95 : vector<8x8xf32>
    %97 = vector.broadcast %88 : vector<1x8xf32> to vector<8x8xf32>
    %98 = arith.mulf %96, %97 : vector<8x8xf32>
    %cst_22 = arith.constant dense<0.000000e+00> : vector<8xf32>
    %99 = vector.multi_reduction <add>, %98, %cst_22 [1] : vector<8x8xf32> to vector<8xf32>
    %100 = vector.shape_cast %99 : vector<8xf32> to vector<8x1xf32>
    %cst_23 = arith.constant dense<0.000000e+00> : vector<8xf32>
    %101 = vector.multi_reduction <add>, %96, %cst_23 [1] : vector<8x8xf32> to vector<8xf32>
    %102 = vector.shape_cast %101 : vector<8xf32> to vector<8x1xf32>
    %103 = arith.divf %100, %102 : vector<8x1xf32>
    %104 = vector.extract_strided_slice %6 {offsets = [3, 0], sizes = [1, 128], strides = [1, 1]} : vector<4x128xf32> to vector<1x128xf32>
    %105 = vector.broadcast %103 : vector<8x1xf32> to vector<8x128xf32>
    %106 = vector.broadcast %104 : vector<1x128xf32> to vector<8x128xf32>
    %107 = arith.mulf %105, %106 : vector<8x128xf32>
    %108 = arith.addf %85, %107 : vector<8x128xf32>
    %c16 = arith.constant 16 : index
    %c0_24 = arith.constant 0 : index
    %109 = vector.load %arg1[%c16, %c0_24] : memref<192x128xf32, #tpu.memory_space<vmem>>, vector<32x128xf32>
    %c48 = arith.constant 48 : index
    %c0_25 = arith.constant 0 : index
    %110 = vector.load %arg1[%c48, %c0_25] : memref<192x128xf32, #tpu.memory_space<vmem>>, vector<64x128xf32>
    %c112 = arith.constant 112 : index
    %c0_26 = arith.constant 0 : index
    %111 = vector.load %arg1[%c112, %c0_26] : memref<192x128xf32, #tpu.memory_space<vmem>>, vector<1x128xf32>
    %112 = tpu.iota {dimensions = array<i32: 0>} : vector<8x32xi32>
    %cst_27 = arith.constant 0.000000e+00 : f32
    %113 = vector.broadcast %cst_27 : f32 to vector<1x32xf32>
    %cst_28 = arith.constant 0.000000e+00 : f32
    %114 = vector.broadcast %cst_28 : f32 to vector<1x32xf32>
    %cst_29 = arith.constant 0.000000e+00 : f32
    %115 = vector.broadcast %cst_29 : f32 to vector<1x32xf32>
    %cst_30 = arith.constant 0.000000e+00 : f32
    %116 = vector.broadcast %cst_30 : f32 to vector<1x32xf32>
    %cst_31 = arith.constant 0.000000e+00 : f32
    %117 = vector.broadcast %cst_31 : f32 to vector<8x32xf32>
    %118 = vector.extract_strided_slice %108 {offsets = [0, 0], sizes = [1, 128], strides = [1, 1]} : vector<8x128xf32> to vector<1x128xf32>
    %cst_32 = arith.constant dense<0.000000e+00> : vector<1x128xf32>
    %119 = tpu.matmul %113, %109, %cst_32 {dimension_numbers = #tpu.dot_dimension_numbers<[1], [0], [0], [1], [0, 0, 1, 1], [], []>} : vector<1x32xf32>, vector<32x128xf32>, vector<1x128xf32> -> vector<1x128xf32>
    %120 = arith.addf %118, %119 : vector<1x128xf32>
    %121 = arith.negf %120 : vector<1x128xf32>
    %122 = math.exp %121 : vector<1x128xf32>
    %cst_33 = arith.constant 1.000000e+00 : f32
    %123 = vector.broadcast %cst_33 : f32 to vector<1x128xf32>
    %124 = arith.addf %123, %122 : vector<1x128xf32>
    %125 = arith.divf %123, %124 : vector<1x128xf32>
    %126 = math.tanh %120 : vector<1x128xf32>
    %127 = vector.extract_strided_slice %125 {offsets = [0, 0], sizes = [1, 32], strides = [1, 1]} : vector<1x128xf32> to vector<1x32xf32>
    %128 = vector.extract_strided_slice %125 {offsets = [0, 32], sizes = [1, 32], strides = [1, 1]} : vector<1x128xf32> to vector<1x32xf32>
    %129 = vector.extract_strided_slice %126 {offsets = [0, 64], sizes = [1, 32], strides = [1, 1]} : vector<1x128xf32> to vector<1x32xf32>
    %130 = vector.extract_strided_slice %125 {offsets = [0, 96], sizes = [1, 32], strides = [1, 1]} : vector<1x128xf32> to vector<1x32xf32>
    %131 = arith.mulf %128, %114 : vector<1x32xf32>
    %132 = arith.mulf %127, %129 : vector<1x32xf32>
    %133 = arith.addf %131, %132 : vector<1x32xf32>
    %134 = math.tanh %133 : vector<1x32xf32>
    %135 = arith.mulf %130, %134 : vector<1x32xf32>
    %136 = vector.extract_strided_slice %108 {offsets = [1, 0], sizes = [1, 128], strides = [1, 1]} : vector<8x128xf32> to vector<1x128xf32>
    %cst_34 = arith.constant dense<0.000000e+00> : vector<1x128xf32>
    %137 = tpu.matmul %135, %109, %cst_34 {dimension_numbers = #tpu.dot_dimension_numbers<[1], [0], [0], [1], [0, 0, 1, 1], [], []>} : vector<1x32xf32>, vector<32x128xf32>, vector<1x128xf32> -> vector<1x128xf32>
    %138 = arith.addf %136, %137 : vector<1x128xf32>
    %139 = tpu.concatenate %135, %115 in 1 : vector<1x32xf32>, vector<1x32xf32> -> vector<1x64xf32>
    %cst_35 = arith.constant dense<0.000000e+00> : vector<1x128xf32>
    %140 = tpu.matmul %139, %110, %cst_35 {dimension_numbers = #tpu.dot_dimension_numbers<[1], [0], [0], [1], [0, 0, 1, 1], [], []>} : vector<1x64xf32>, vector<64x128xf32>, vector<1x128xf32> -> vector<1x128xf32>
    %141 = arith.addf %111, %140 : vector<1x128xf32>
    %142 = arith.negf %141 : vector<1x128xf32>
    %143 = math.exp %142 : vector<1x128xf32>
    %cst_36 = arith.constant 1.000000e+00 : f32
    %144 = vector.broadcast %cst_36 : f32 to vector<1x128xf32>
    %145 = arith.addf %144, %143 : vector<1x128xf32>
    %146 = arith.divf %144, %145 : vector<1x128xf32>
    %147 = math.tanh %141 : vector<1x128xf32>
    %148 = vector.extract_strided_slice %146 {offsets = [0, 0], sizes = [1, 32], strides = [1, 1]} : vector<1x128xf32> to vector<1x32xf32>
    %149 = vector.extract_strided_slice %146 {offsets = [0, 32], sizes = [1, 32], strides = [1, 1]} : vector<1x128xf32> to vector<1x32xf32>
    %150 = vector.extract_strided_slice %147 {offsets = [0, 64], sizes = [1, 32], strides = [1, 1]} : vector<1x128xf32> to vector<1x32xf32>
    %151 = vector.extract_strided_slice %146 {offsets = [0, 96], sizes = [1, 32], strides = [1, 1]} : vector<1x128xf32> to vector<1x32xf32>
    %152 = arith.mulf %149, %116 : vector<1x32xf32>
    %153 = arith.mulf %148, %150 : vector<1x32xf32>
    %154 = arith.addf %152, %153 : vector<1x32xf32>
    %155 = math.tanh %154 : vector<1x32xf32>
    %156 = arith.mulf %151, %155 : vector<1x32xf32>
    %c0_i32 = arith.constant 0 : i32
    %157 = vector.broadcast %c0_i32 : i32 to vector<8x32xi32>
    %158 = arith.cmpi eq, %112, %157 : vector<8x32xi32>
    %159 = vector.shape_cast %156 : vector<1x32xf32> to vector<1x32xf32>
    %160 = vector.broadcast %159 : vector<1x32xf32> to vector<8x32xf32>
    %161 = arith.select %158, %160, %117 : vector<8x32xi1>, vector<8x32xf32>
    %162 = arith.negf %138 : vector<1x128xf32>
    %163 = math.exp %162 : vector<1x128xf32>
    %cst_37 = arith.constant 1.000000e+00 : f32
    %164 = vector.broadcast %cst_37 : f32 to vector<1x128xf32>
    %165 = arith.addf %164, %163 : vector<1x128xf32>
    %166 = arith.divf %164, %165 : vector<1x128xf32>
    %167 = math.tanh %138 : vector<1x128xf32>
    %168 = vector.extract_strided_slice %166 {offsets = [0, 0], sizes = [1, 32], strides = [1, 1]} : vector<1x128xf32> to vector<1x32xf32>
    %169 = vector.extract_strided_slice %166 {offsets = [0, 32], sizes = [1, 32], strides = [1, 1]} : vector<1x128xf32> to vector<1x32xf32>
    %170 = vector.extract_strided_slice %167 {offsets = [0, 64], sizes = [1, 32], strides = [1, 1]} : vector<1x128xf32> to vector<1x32xf32>
    %171 = vector.extract_strided_slice %166 {offsets = [0, 96], sizes = [1, 32], strides = [1, 1]} : vector<1x128xf32> to vector<1x32xf32>
    %172 = arith.mulf %169, %133 : vector<1x32xf32>
    %173 = arith.mulf %168, %170 : vector<1x32xf32>
    %174 = arith.addf %172, %173 : vector<1x32xf32>
    %175 = math.tanh %174 : vector<1x32xf32>
    %176 = arith.mulf %171, %175 : vector<1x32xf32>
    %177 = vector.extract_strided_slice %108 {offsets = [2, 0], sizes = [1, 128], strides = [1, 1]} : vector<8x128xf32> to vector<1x128xf32>
    %cst_38 = arith.constant dense<0.000000e+00> : vector<1x128xf32>
    %178 = tpu.matmul %176, %109, %cst_38 {dimension_numbers = #tpu.dot_dimension_numbers<[1], [0], [0], [1], [0, 0, 1, 1], [], []>} : vector<1x32xf32>, vector<32x128xf32>, vector<1x128xf32> -> vector<1x128xf32>
    %179 = arith.addf %177, %178 : vector<1x128xf32>
    %180 = tpu.concatenate %176, %156 in 1 : vector<1x32xf32>, vector<1x32xf32> -> vector<1x64xf32>
    %cst_39 = arith.constant dense<0.000000e+00> : vector<1x128xf32>
    %181 = tpu.matmul %180, %110, %cst_39 {dimension_numbers = #tpu.dot_dimension_numbers<[1], [0], [0], [1], [0, 0, 1, 1], [], []>} : vector<1x64xf32>, vector<64x128xf32>, vector<1x128xf32> -> vector<1x128xf32>
    %182 = arith.addf %111, %181 : vector<1x128xf32>
    %183 = arith.negf %182 : vector<1x128xf32>
    %184 = math.exp %183 : vector<1x128xf32>
    %cst_40 = arith.constant 1.000000e+00 : f32
    %185 = vector.broadcast %cst_40 : f32 to vector<1x128xf32>
    %186 = arith.addf %185, %184 : vector<1x128xf32>
    %187 = arith.divf %185, %186 : vector<1x128xf32>
    %188 = math.tanh %182 : vector<1x128xf32>
    %189 = vector.extract_strided_slice %187 {offsets = [0, 0], sizes = [1, 32], strides = [1, 1]} : vector<1x128xf32> to vector<1x32xf32>
    %190 = vector.extract_strided_slice %187 {offsets = [0, 32], sizes = [1, 32], strides = [1, 1]} : vector<1x128xf32> to vector<1x32xf32>
    %191 = vector.extract_strided_slice %188 {offsets = [0, 64], sizes = [1, 32], strides = [1, 1]} : vector<1x128xf32> to vector<1x32xf32>
    %192 = vector.extract_strided_slice %187 {offsets = [0, 96], sizes = [1, 32], strides = [1, 1]} : vector<1x128xf32> to vector<1x32xf32>
    %193 = arith.mulf %190, %154 : vector<1x32xf32>
    %194 = arith.mulf %189, %191 : vector<1x32xf32>
    %195 = arith.addf %193, %194 : vector<1x32xf32>
    %196 = math.tanh %195 : vector<1x32xf32>
    %197 = arith.mulf %192, %196 : vector<1x32xf32>
    %c1_i32 = arith.constant 1 : i32
    %198 = vector.broadcast %c1_i32 : i32 to vector<8x32xi32>
    %199 = arith.cmpi eq, %112, %198 : vector<8x32xi32>
    %200 = vector.shape_cast %197 : vector<1x32xf32> to vector<1x32xf32>
    %201 = vector.broadcast %200 : vector<1x32xf32> to vector<8x32xf32>
    %202 = arith.select %199, %201, %161 : vector<8x32xi1>, vector<8x32xf32>
    %203 = arith.negf %179 : vector<1x128xf32>
    %204 = math.exp %203 : vector<1x128xf32>
    %cst_41 = arith.constant 1.000000e+00 : f32
    %205 = vector.broadcast %cst_41 : f32 to vector<1x128xf32>
    %206 = arith.addf %205, %204 : vector<1x128xf32>
    %207 = arith.divf %205, %206 : vector<1x128xf32>
    %208 = math.tanh %179 : vector<1x128xf32>
    %209 = vector.extract_strided_slice %207 {offsets = [0, 0], sizes = [1, 32], strides = [1, 1]} : vector<1x128xf32> to vector<1x32xf32>
    %210 = vector.extract_strided_slice %207 {offsets = [0, 32], sizes = [1, 32], strides = [1, 1]} : vector<1x128xf32> to vector<1x32xf32>
    %211 = vector.extract_strided_slice %208 {offsets = [0, 64], sizes = [1, 32], strides = [1, 1]} : vector<1x128xf32> to vector<1x32xf32>
    %212 = vector.extract_strided_slice %207 {offsets = [0, 96], sizes = [1, 32], strides = [1, 1]} : vector<1x128xf32> to vector<1x32xf32>
    %213 = arith.mulf %210, %174 : vector<1x32xf32>
    %214 = arith.mulf %209, %211 : vector<1x32xf32>
    %215 = arith.addf %213, %214 : vector<1x32xf32>
    %216 = math.tanh %215 : vector<1x32xf32>
    %217 = arith.mulf %212, %216 : vector<1x32xf32>
    %218 = vector.extract_strided_slice %108 {offsets = [3, 0], sizes = [1, 128], strides = [1, 1]} : vector<8x128xf32> to vector<1x128xf32>
    %cst_42 = arith.constant dense<0.000000e+00> : vector<1x128xf32>
    %219 = tpu.matmul %217, %109, %cst_42 {dimension_numbers = #tpu.dot_dimension_numbers<[1], [0], [0], [1], [0, 0, 1, 1], [], []>} : vector<1x32xf32>, vector<32x128xf32>, vector<1x128xf32> -> vector<1x128xf32>
    %220 = arith.addf %218, %219 : vector<1x128xf32>
    %221 = tpu.concatenate %217, %197 in 1 : vector<1x32xf32>, vector<1x32xf32> -> vector<1x64xf32>
    %cst_43 = arith.constant dense<0.000000e+00> : vector<1x128xf32>
    %222 = tpu.matmul %221, %110, %cst_43 {dimension_numbers = #tpu.dot_dimension_numbers<[1], [0], [0], [1], [0, 0, 1, 1], [], []>} : vector<1x64xf32>, vector<64x128xf32>, vector<1x128xf32> -> vector<1x128xf32>
    %223 = arith.addf %111, %222 : vector<1x128xf32>
    %224 = arith.negf %223 : vector<1x128xf32>
    %225 = math.exp %224 : vector<1x128xf32>
    %cst_44 = arith.constant 1.000000e+00 : f32
    %226 = vector.broadcast %cst_44 : f32 to vector<1x128xf32>
    %227 = arith.addf %226, %225 : vector<1x128xf32>
    %228 = arith.divf %226, %227 : vector<1x128xf32>
    %229 = math.tanh %223 : vector<1x128xf32>
    %230 = vector.extract_strided_slice %228 {offsets = [0, 0], sizes = [1, 32], strides = [1, 1]} : vector<1x128xf32> to vector<1x32xf32>
    %231 = vector.extract_strided_slice %228 {offsets = [0, 32], sizes = [1, 32], strides = [1, 1]} : vector<1x128xf32> to vector<1x32xf32>
    %232 = vector.extract_strided_slice %229 {offsets = [0, 64], sizes = [1, 32], strides = [1, 1]} : vector<1x128xf32> to vector<1x32xf32>
    %233 = vector.extract_strided_slice %228 {offsets = [0, 96], sizes = [1, 32], strides = [1, 1]} : vector<1x128xf32> to vector<1x32xf32>
    %234 = arith.mulf %231, %195 : vector<1x32xf32>
    %235 = arith.mulf %230, %232 : vector<1x32xf32>
    %236 = arith.addf %234, %235 : vector<1x32xf32>
    %237 = math.tanh %236 : vector<1x32xf32>
    %238 = arith.mulf %233, %237 : vector<1x32xf32>
    %c2_i32 = arith.constant 2 : i32
    %239 = vector.broadcast %c2_i32 : i32 to vector<8x32xi32>
    %240 = arith.cmpi eq, %112, %239 : vector<8x32xi32>
    %241 = vector.shape_cast %238 : vector<1x32xf32> to vector<1x32xf32>
    %242 = vector.broadcast %241 : vector<1x32xf32> to vector<8x32xf32>
    %243 = arith.select %240, %242, %202 : vector<8x32xi1>, vector<8x32xf32>
    %244 = arith.negf %220 : vector<1x128xf32>
    %245 = math.exp %244 : vector<1x128xf32>
    %cst_45 = arith.constant 1.000000e+00 : f32
    %246 = vector.broadcast %cst_45 : f32 to vector<1x128xf32>
    %247 = arith.addf %246, %245 : vector<1x128xf32>
    %248 = arith.divf %246, %247 : vector<1x128xf32>
    %249 = math.tanh %220 : vector<1x128xf32>
    %250 = vector.extract_strided_slice %248 {offsets = [0, 0], sizes = [1, 32], strides = [1, 1]} : vector<1x128xf32> to vector<1x32xf32>
    %251 = vector.extract_strided_slice %248 {offsets = [0, 32], sizes = [1, 32], strides = [1, 1]} : vector<1x128xf32> to vector<1x32xf32>
    %252 = vector.extract_strided_slice %249 {offsets = [0, 64], sizes = [1, 32], strides = [1, 1]} : vector<1x128xf32> to vector<1x32xf32>
    %253 = vector.extract_strided_slice %248 {offsets = [0, 96], sizes = [1, 32], strides = [1, 1]} : vector<1x128xf32> to vector<1x32xf32>
    %254 = arith.mulf %251, %215 : vector<1x32xf32>
    %255 = arith.mulf %250, %252 : vector<1x32xf32>
    %256 = arith.addf %254, %255 : vector<1x32xf32>
    %257 = math.tanh %256 : vector<1x32xf32>
    %258 = arith.mulf %253, %257 : vector<1x32xf32>
    %259 = vector.extract_strided_slice %108 {offsets = [4, 0], sizes = [1, 128], strides = [1, 1]} : vector<8x128xf32> to vector<1x128xf32>
    %cst_46 = arith.constant dense<0.000000e+00> : vector<1x128xf32>
    %260 = tpu.matmul %258, %109, %cst_46 {dimension_numbers = #tpu.dot_dimension_numbers<[1], [0], [0], [1], [0, 0, 1, 1], [], []>} : vector<1x32xf32>, vector<32x128xf32>, vector<1x128xf32> -> vector<1x128xf32>
    %261 = arith.addf %259, %260 : vector<1x128xf32>
    %262 = tpu.concatenate %258, %238 in 1 : vector<1x32xf32>, vector<1x32xf32> -> vector<1x64xf32>
    %cst_47 = arith.constant dense<0.000000e+00> : vector<1x128xf32>
    %263 = tpu.matmul %262, %110, %cst_47 {dimension_numbers = #tpu.dot_dimension_numbers<[1], [0], [0], [1], [0, 0, 1, 1], [], []>} : vector<1x64xf32>, vector<64x128xf32>, vector<1x128xf32> -> vector<1x128xf32>
    %264 = arith.addf %111, %263 : vector<1x128xf32>
    %265 = arith.negf %264 : vector<1x128xf32>
    %266 = math.exp %265 : vector<1x128xf32>
    %cst_48 = arith.constant 1.000000e+00 : f32
    %267 = vector.broadcast %cst_48 : f32 to vector<1x128xf32>
    %268 = arith.addf %267, %266 : vector<1x128xf32>
    %269 = arith.divf %267, %268 : vector<1x128xf32>
    %270 = math.tanh %264 : vector<1x128xf32>
    %271 = vector.extract_strided_slice %269 {offsets = [0, 0], sizes = [1, 32], strides = [1, 1]} : vector<1x128xf32> to vector<1x32xf32>
    %272 = vector.extract_strided_slice %269 {offsets = [0, 32], sizes = [1, 32], strides = [1, 1]} : vector<1x128xf32> to vector<1x32xf32>
    %273 = vector.extract_strided_slice %270 {offsets = [0, 64], sizes = [1, 32], strides = [1, 1]} : vector<1x128xf32> to vector<1x32xf32>
    %274 = vector.extract_strided_slice %269 {offsets = [0, 96], sizes = [1, 32], strides = [1, 1]} : vector<1x128xf32> to vector<1x32xf32>
    %275 = arith.mulf %272, %236 : vector<1x32xf32>
    %276 = arith.mulf %271, %273 : vector<1x32xf32>
    %277 = arith.addf %275, %276 : vector<1x32xf32>
    %278 = math.tanh %277 : vector<1x32xf32>
    %279 = arith.mulf %274, %278 : vector<1x32xf32>
    %c3_i32 = arith.constant 3 : i32
    %280 = vector.broadcast %c3_i32 : i32 to vector<8x32xi32>
    %281 = arith.cmpi eq, %112, %280 : vector<8x32xi32>
    %282 = vector.shape_cast %279 : vector<1x32xf32> to vector<1x32xf32>
    %283 = vector.broadcast %282 : vector<1x32xf32> to vector<8x32xf32>
    %284 = arith.select %281, %283, %243 : vector<8x32xi1>, vector<8x32xf32>
    %285 = arith.negf %261 : vector<1x128xf32>
    %286 = math.exp %285 : vector<1x128xf32>
    %cst_49 = arith.constant 1.000000e+00 : f32
    %287 = vector.broadcast %cst_49 : f32 to vector<1x128xf32>
    %288 = arith.addf %287, %286 : vector<1x128xf32>
    %289 = arith.divf %287, %288 : vector<1x128xf32>
    %290 = math.tanh %261 : vector<1x128xf32>
    %291 = vector.extract_strided_slice %289 {offsets = [0, 0], sizes = [1, 32], strides = [1, 1]} : vector<1x128xf32> to vector<1x32xf32>
    %292 = vector.extract_strided_slice %289 {offsets = [0, 32], sizes = [1, 32], strides = [1, 1]} : vector<1x128xf32> to vector<1x32xf32>
    %293 = vector.extract_strided_slice %290 {offsets = [0, 64], sizes = [1, 32], strides = [1, 1]} : vector<1x128xf32> to vector<1x32xf32>
    %294 = vector.extract_strided_slice %289 {offsets = [0, 96], sizes = [1, 32], strides = [1, 1]} : vector<1x128xf32> to vector<1x32xf32>
    %295 = arith.mulf %292, %256 : vector<1x32xf32>
    %296 = arith.mulf %291, %293 : vector<1x32xf32>
    %297 = arith.addf %295, %296 : vector<1x32xf32>
    %298 = math.tanh %297 : vector<1x32xf32>
    %299 = arith.mulf %294, %298 : vector<1x32xf32>
    %300 = vector.extract_strided_slice %108 {offsets = [5, 0], sizes = [1, 128], strides = [1, 1]} : vector<8x128xf32> to vector<1x128xf32>
    %cst_50 = arith.constant dense<0.000000e+00> : vector<1x128xf32>
    %301 = tpu.matmul %299, %109, %cst_50 {dimension_numbers = #tpu.dot_dimension_numbers<[1], [0], [0], [1], [0, 0, 1, 1], [], []>} : vector<1x32xf32>, vector<32x128xf32>, vector<1x128xf32> -> vector<1x128xf32>
    %302 = arith.addf %300, %301 : vector<1x128xf32>
    %303 = tpu.concatenate %299, %279 in 1 : vector<1x32xf32>, vector<1x32xf32> -> vector<1x64xf32>
    %cst_51 = arith.constant dense<0.000000e+00> : vector<1x128xf32>
    %304 = tpu.matmul %303, %110, %cst_51 {dimension_numbers = #tpu.dot_dimension_numbers<[1], [0], [0], [1], [0, 0, 1, 1], [], []>} : vector<1x64xf32>, vector<64x128xf32>, vector<1x128xf32> -> vector<1x128xf32>
    %305 = arith.addf %111, %304 : vector<1x128xf32>
    %306 = arith.negf %305 : vector<1x128xf32>
    %307 = math.exp %306 : vector<1x128xf32>
    %cst_52 = arith.constant 1.000000e+00 : f32
    %308 = vector.broadcast %cst_52 : f32 to vector<1x128xf32>
    %309 = arith.addf %308, %307 : vector<1x128xf32>
    %310 = arith.divf %308, %309 : vector<1x128xf32>
    %311 = math.tanh %305 : vector<1x128xf32>
    %312 = vector.extract_strided_slice %310 {offsets = [0, 0], sizes = [1, 32], strides = [1, 1]} : vector<1x128xf32> to vector<1x32xf32>
    %313 = vector.extract_strided_slice %310 {offsets = [0, 32], sizes = [1, 32], strides = [1, 1]} : vector<1x128xf32> to vector<1x32xf32>
    %314 = vector.extract_strided_slice %311 {offsets = [0, 64], sizes = [1, 32], strides = [1, 1]} : vector<1x128xf32> to vector<1x32xf32>
    %315 = vector.extract_strided_slice %310 {offsets = [0, 96], sizes = [1, 32], strides = [1, 1]} : vector<1x128xf32> to vector<1x32xf32>
    %316 = arith.mulf %313, %277 : vector<1x32xf32>
    %317 = arith.mulf %312, %314 : vector<1x32xf32>
    %318 = arith.addf %316, %317 : vector<1x32xf32>
    %319 = math.tanh %318 : vector<1x32xf32>
    %320 = arith.mulf %315, %319 : vector<1x32xf32>
    %c4_i32 = arith.constant 4 : i32
    %321 = vector.broadcast %c4_i32 : i32 to vector<8x32xi32>
    %322 = arith.cmpi eq, %112, %321 : vector<8x32xi32>
    %323 = vector.shape_cast %320 : vector<1x32xf32> to vector<1x32xf32>
    %324 = vector.broadcast %323 : vector<1x32xf32> to vector<8x32xf32>
    %325 = arith.select %322, %324, %284 : vector<8x32xi1>, vector<8x32xf32>
    %326 = arith.negf %302 : vector<1x128xf32>
    %327 = math.exp %326 : vector<1x128xf32>
    %cst_53 = arith.constant 1.000000e+00 : f32
    %328 = vector.broadcast %cst_53 : f32 to vector<1x128xf32>
    %329 = arith.addf %328, %327 : vector<1x128xf32>
    %330 = arith.divf %328, %329 : vector<1x128xf32>
    %331 = math.tanh %302 : vector<1x128xf32>
    %332 = vector.extract_strided_slice %330 {offsets = [0, 0], sizes = [1, 32], strides = [1, 1]} : vector<1x128xf32> to vector<1x32xf32>
    %333 = vector.extract_strided_slice %330 {offsets = [0, 32], sizes = [1, 32], strides = [1, 1]} : vector<1x128xf32> to vector<1x32xf32>
    %334 = vector.extract_strided_slice %331 {offsets = [0, 64], sizes = [1, 32], strides = [1, 1]} : vector<1x128xf32> to vector<1x32xf32>
    %335 = vector.extract_strided_slice %330 {offsets = [0, 96], sizes = [1, 32], strides = [1, 1]} : vector<1x128xf32> to vector<1x32xf32>
    %336 = arith.mulf %333, %297 : vector<1x32xf32>
    %337 = arith.mulf %332, %334 : vector<1x32xf32>
    %338 = arith.addf %336, %337 : vector<1x32xf32>
    %339 = math.tanh %338 : vector<1x32xf32>
    %340 = arith.mulf %335, %339 : vector<1x32xf32>
    %341 = vector.extract_strided_slice %108 {offsets = [6, 0], sizes = [1, 128], strides = [1, 1]} : vector<8x128xf32> to vector<1x128xf32>
    %cst_54 = arith.constant dense<0.000000e+00> : vector<1x128xf32>
    %342 = tpu.matmul %340, %109, %cst_54 {dimension_numbers = #tpu.dot_dimension_numbers<[1], [0], [0], [1], [0, 0, 1, 1], [], []>} : vector<1x32xf32>, vector<32x128xf32>, vector<1x128xf32> -> vector<1x128xf32>
    %343 = arith.addf %341, %342 : vector<1x128xf32>
    %344 = tpu.concatenate %340, %320 in 1 : vector<1x32xf32>, vector<1x32xf32> -> vector<1x64xf32>
    %cst_55 = arith.constant dense<0.000000e+00> : vector<1x128xf32>
    %345 = tpu.matmul %344, %110, %cst_55 {dimension_numbers = #tpu.dot_dimension_numbers<[1], [0], [0], [1], [0, 0, 1, 1], [], []>} : vector<1x64xf32>, vector<64x128xf32>, vector<1x128xf32> -> vector<1x128xf32>
    %346 = arith.addf %111, %345 : vector<1x128xf32>
    %347 = arith.negf %346 : vector<1x128xf32>
    %348 = math.exp %347 : vector<1x128xf32>
    %cst_56 = arith.constant 1.000000e+00 : f32
    %349 = vector.broadcast %cst_56 : f32 to vector<1x128xf32>
    %350 = arith.addf %349, %348 : vector<1x128xf32>
    %351 = arith.divf %349, %350 : vector<1x128xf32>
    %352 = math.tanh %346 : vector<1x128xf32>
    %353 = vector.extract_strided_slice %351 {offsets = [0, 0], sizes = [1, 32], strides = [1, 1]} : vector<1x128xf32> to vector<1x32xf32>
    %354 = vector.extract_strided_slice %351 {offsets = [0, 32], sizes = [1, 32], strides = [1, 1]} : vector<1x128xf32> to vector<1x32xf32>
    %355 = vector.extract_strided_slice %352 {offsets = [0, 64], sizes = [1, 32], strides = [1, 1]} : vector<1x128xf32> to vector<1x32xf32>
    %356 = vector.extract_strided_slice %351 {offsets = [0, 96], sizes = [1, 32], strides = [1, 1]} : vector<1x128xf32> to vector<1x32xf32>
    %357 = arith.mulf %354, %318 : vector<1x32xf32>
    %358 = arith.mulf %353, %355 : vector<1x32xf32>
    %359 = arith.addf %357, %358 : vector<1x32xf32>
    %360 = math.tanh %359 : vector<1x32xf32>
    %361 = arith.mulf %356, %360 : vector<1x32xf32>
    %c5_i32 = arith.constant 5 : i32
    %362 = vector.broadcast %c5_i32 : i32 to vector<8x32xi32>
    %363 = arith.cmpi eq, %112, %362 : vector<8x32xi32>
    %364 = vector.shape_cast %361 : vector<1x32xf32> to vector<1x32xf32>
    %365 = vector.broadcast %364 : vector<1x32xf32> to vector<8x32xf32>
    %366 = arith.select %363, %365, %325 : vector<8x32xi1>, vector<8x32xf32>
    %367 = arith.negf %343 : vector<1x128xf32>
    %368 = math.exp %367 : vector<1x128xf32>
    %cst_57 = arith.constant 1.000000e+00 : f32
    %369 = vector.broadcast %cst_57 : f32 to vector<1x128xf32>
    %370 = arith.addf %369, %368 : vector<1x128xf32>
    %371 = arith.divf %369, %370 : vector<1x128xf32>
    %372 = math.tanh %343 : vector<1x128xf32>
    %373 = vector.extract_strided_slice %371 {offsets = [0, 0], sizes = [1, 32], strides = [1, 1]} : vector<1x128xf32> to vector<1x32xf32>
    %374 = vector.extract_strided_slice %371 {offsets = [0, 32], sizes = [1, 32], strides = [1, 1]} : vector<1x128xf32> to vector<1x32xf32>
    %375 = vector.extract_strided_slice %372 {offsets = [0, 64], sizes = [1, 32], strides = [1, 1]} : vector<1x128xf32> to vector<1x32xf32>
    %376 = vector.extract_strided_slice %371 {offsets = [0, 96], sizes = [1, 32], strides = [1, 1]} : vector<1x128xf32> to vector<1x32xf32>
    %377 = arith.mulf %374, %338 : vector<1x32xf32>
    %378 = arith.mulf %373, %375 : vector<1x32xf32>
    %379 = arith.addf %377, %378 : vector<1x32xf32>
    %380 = math.tanh %379 : vector<1x32xf32>
    %381 = arith.mulf %376, %380 : vector<1x32xf32>
    %382 = vector.extract_strided_slice %108 {offsets = [7, 0], sizes = [1, 128], strides = [1, 1]} : vector<8x128xf32> to vector<1x128xf32>
    %cst_58 = arith.constant dense<0.000000e+00> : vector<1x128xf32>
    %383 = tpu.matmul %381, %109, %cst_58 {dimension_numbers = #tpu.dot_dimension_numbers<[1], [0], [0], [1], [0, 0, 1, 1], [], []>} : vector<1x32xf32>, vector<32x128xf32>, vector<1x128xf32> -> vector<1x128xf32>
    %384 = arith.addf %382, %383 : vector<1x128xf32>
    %385 = tpu.concatenate %381, %361 in 1 : vector<1x32xf32>, vector<1x32xf32> -> vector<1x64xf32>
    %cst_59 = arith.constant dense<0.000000e+00> : vector<1x128xf32>
    %386 = tpu.matmul %385, %110, %cst_59 {dimension_numbers = #tpu.dot_dimension_numbers<[1], [0], [0], [1], [0, 0, 1, 1], [], []>} : vector<1x64xf32>, vector<64x128xf32>, vector<1x128xf32> -> vector<1x128xf32>
    %387 = arith.addf %111, %386 : vector<1x128xf32>
    %388 = arith.negf %387 : vector<1x128xf32>
    %389 = math.exp %388 : vector<1x128xf32>
    %cst_60 = arith.constant 1.000000e+00 : f32
    %390 = vector.broadcast %cst_60 : f32 to vector<1x128xf32>
    %391 = arith.addf %390, %389 : vector<1x128xf32>
    %392 = arith.divf %390, %391 : vector<1x128xf32>
    %393 = math.tanh %387 : vector<1x128xf32>
    %394 = vector.extract_strided_slice %392 {offsets = [0, 0], sizes = [1, 32], strides = [1, 1]} : vector<1x128xf32> to vector<1x32xf32>
    %395 = vector.extract_strided_slice %392 {offsets = [0, 32], sizes = [1, 32], strides = [1, 1]} : vector<1x128xf32> to vector<1x32xf32>
    %396 = vector.extract_strided_slice %393 {offsets = [0, 64], sizes = [1, 32], strides = [1, 1]} : vector<1x128xf32> to vector<1x32xf32>
    %397 = vector.extract_strided_slice %392 {offsets = [0, 96], sizes = [1, 32], strides = [1, 1]} : vector<1x128xf32> to vector<1x32xf32>
    %398 = arith.mulf %395, %359 : vector<1x32xf32>
    %399 = arith.mulf %394, %396 : vector<1x32xf32>
    %400 = arith.addf %398, %399 : vector<1x32xf32>
    %401 = math.tanh %400 : vector<1x32xf32>
    %402 = arith.mulf %397, %401 : vector<1x32xf32>
    %c6_i32 = arith.constant 6 : i32
    %403 = vector.broadcast %c6_i32 : i32 to vector<8x32xi32>
    %404 = arith.cmpi eq, %112, %403 : vector<8x32xi32>
    %405 = vector.shape_cast %402 : vector<1x32xf32> to vector<1x32xf32>
    %406 = vector.broadcast %405 : vector<1x32xf32> to vector<8x32xf32>
    %407 = arith.select %404, %406, %366 : vector<8x32xi1>, vector<8x32xf32>
    %408 = arith.negf %384 : vector<1x128xf32>
    %409 = math.exp %408 : vector<1x128xf32>
    %cst_61 = arith.constant 1.000000e+00 : f32
    %410 = vector.broadcast %cst_61 : f32 to vector<1x128xf32>
    %411 = arith.addf %410, %409 : vector<1x128xf32>
    %412 = arith.divf %410, %411 : vector<1x128xf32>
    %413 = math.tanh %384 : vector<1x128xf32>
    %414 = vector.extract_strided_slice %412 {offsets = [0, 0], sizes = [1, 32], strides = [1, 1]} : vector<1x128xf32> to vector<1x32xf32>
    %415 = vector.extract_strided_slice %412 {offsets = [0, 32], sizes = [1, 32], strides = [1, 1]} : vector<1x128xf32> to vector<1x32xf32>
    %416 = vector.extract_strided_slice %413 {offsets = [0, 64], sizes = [1, 32], strides = [1, 1]} : vector<1x128xf32> to vector<1x32xf32>
    %417 = vector.extract_strided_slice %412 {offsets = [0, 96], sizes = [1, 32], strides = [1, 1]} : vector<1x128xf32> to vector<1x32xf32>
    %418 = arith.mulf %415, %379 : vector<1x32xf32>
    %419 = arith.mulf %414, %416 : vector<1x32xf32>
    %420 = arith.addf %418, %419 : vector<1x32xf32>
    %421 = math.tanh %420 : vector<1x32xf32>
    %422 = arith.mulf %417, %421 : vector<1x32xf32>
    %423 = tpu.concatenate %422, %402 in 1 : vector<1x32xf32>, vector<1x32xf32> -> vector<1x64xf32>
    %cst_62 = arith.constant dense<0.000000e+00> : vector<1x128xf32>
    %424 = tpu.matmul %423, %110, %cst_62 {dimension_numbers = #tpu.dot_dimension_numbers<[1], [0], [0], [1], [0, 0, 1, 1], [], []>} : vector<1x64xf32>, vector<64x128xf32>, vector<1x128xf32> -> vector<1x128xf32>
    %425 = arith.addf %111, %424 : vector<1x128xf32>
    %426 = arith.negf %425 : vector<1x128xf32>
    %427 = math.exp %426 : vector<1x128xf32>
    %cst_63 = arith.constant 1.000000e+00 : f32
    %428 = vector.broadcast %cst_63 : f32 to vector<1x128xf32>
    %429 = arith.addf %428, %427 : vector<1x128xf32>
    %430 = arith.divf %428, %429 : vector<1x128xf32>
    %431 = math.tanh %425 : vector<1x128xf32>
    %432 = vector.extract_strided_slice %430 {offsets = [0, 0], sizes = [1, 32], strides = [1, 1]} : vector<1x128xf32> to vector<1x32xf32>
    %433 = vector.extract_strided_slice %430 {offsets = [0, 32], sizes = [1, 32], strides = [1, 1]} : vector<1x128xf32> to vector<1x32xf32>
    %434 = vector.extract_strided_slice %431 {offsets = [0, 64], sizes = [1, 32], strides = [1, 1]} : vector<1x128xf32> to vector<1x32xf32>
    %435 = vector.extract_strided_slice %430 {offsets = [0, 96], sizes = [1, 32], strides = [1, 1]} : vector<1x128xf32> to vector<1x32xf32>
    %436 = arith.mulf %433, %400 : vector<1x32xf32>
    %437 = arith.mulf %432, %434 : vector<1x32xf32>
    %438 = arith.addf %436, %437 : vector<1x32xf32>
    %439 = math.tanh %438 : vector<1x32xf32>
    %440 = arith.mulf %435, %439 : vector<1x32xf32>
    %c7_i32 = arith.constant 7 : i32
    %441 = vector.broadcast %c7_i32 : i32 to vector<8x32xi32>
    %442 = arith.cmpi eq, %112, %441 : vector<8x32xi32>
    %443 = vector.shape_cast %440 : vector<1x32xf32> to vector<1x32xf32>
    %444 = vector.broadcast %443 : vector<1x32xf32> to vector<8x32xf32>
    %445 = arith.select %442, %444, %407 : vector<8x32xi1>, vector<8x32xf32>
    %c120 = arith.constant 120 : index
    %c0_64 = arith.constant 0 : index
    %446 = vector.load %arg1[%c120, %c0_64] : memref<192x128xf32, #tpu.memory_space<vmem>>, vector<32x128xf32>
    %c152 = arith.constant 152 : index
    %c0_65 = arith.constant 0 : index
    %447 = vector.load %arg1[%c152, %c0_65] : memref<192x128xf32, #tpu.memory_space<vmem>>, vector<1x128xf32>
    %cst_66 = arith.constant dense<0.000000e+00> : vector<8x128xf32>
    %448 = tpu.matmul %445, %446, %cst_66 {dimension_numbers = #tpu.dot_dimension_numbers<[1], [0], [0], [1], [0, 0, 1, 1], [], []>} : vector<8x32xf32>, vector<32x128xf32>, vector<8x128xf32> -> vector<8x128xf32>
    %449 = vector.broadcast %447 : vector<1x128xf32> to vector<8x128xf32>
    %450 = arith.addf %448, %449 : vector<8x128xf32>
    %451 = vector.extract_strided_slice %450 {offsets = [0, 0], sizes = [8, 6], strides = [1, 1]} : vector<8x128xf32> to vector<8x6xf32>
    %c0_67 = arith.constant 0 : index
    %c0_68 = arith.constant 0 : index
    %452 = vector.load %arg2[%c0_67, %c0_68] : memref<8x6xf32, #tpu.memory_space<vmem>>, vector<8x6xf32>
    tpu.vector_store %arg2[%c0_67, %c0_68], %451 {strides = array<i32>} : memref<8x6xf32, #tpu.memory_space<vmem>>, vector<8x6xf32>,
    return
  }
}

</mosaic_0001>

<bundles_post_ra>
// kernel: forward.1
= control target key start
LH: loop header
LB: loop body
LE: loop exit
PB: predicated region body
PF: predicated region fallthrough
CT: control target
= control target key end

     0   :  { %7 = vsyncpa [#allocation3], 0  ;;  %s2096_s0 = inlined_call_operand.vmem [shape: f32[16,8], index: 0, kind: input, shape index: {}]   ;;  %s2097_s1 = inlined_call_operand.hbm [shape: f32[192,128], index: 1, kind: input, shape index: {}]   ;;  %s2098_s2 = inlined_call_operand.hbm [shape: f32[8,6], index: 2, kind: output, shape index: {}]  }
   0x1   :  { %8 = vsyncpa [#allocation4], 0  ;;  %s15_s11 = sshll.u32 %s2097_s1, 4  ;;  %s1706_s12 = smov [#allocation2]   ;;  %s16_s11 = int_to_ptr.hbm [resolvable:$true] %s15_s11 }
   0x2   :  { %s17_s13 = sshll.u32 %s1706_s12, 4  ;;  %s1707_s14 = smov 128   ;;  %s18_s13 = int_to_ptr.vmem [resolvable:$true] %s17_s13 }
   0x3   :  { %s1708_s15 = smov 8  }
   0x4   :  { %23 = dma.hbm_to_vmem [thread:$0]  %s16_s11, 3072, %s18_s13, [#allocation3], %s1707_s14, %s1707_s14, %s1708_s15  }
   0x5   :  { %1702 = dma.done.wait [#allocation3], 3072  }
   0x6   :  { %1703 = vsyncadd [#allocation3], 4294964224  ;;  %v1709_v0 = vmov 0   ;;  %vm41_vm0 = vcmask 1043456   ;;  %vm37_vm1 = vcmask 31744   ;;  %v28_v2 = vld [vmem:[%s2096_s0] sm:$0xff] }
   0x7   :  { %1501 = vset.pattern.permute.xlu0 %v1709_v0  ;;  %v30_v1 = vld [vmem:[#allocation2 + $0xa0] sm:$0xf]  ;;  %v29_v3 = vld [vmem:[%s2096_s0 + $0x8] sm:$0xf]  ;;  %v32_v4 = vld [vmem:[#allocation2 + $0xb0] sm:$0xff]  ;;  %v1710_v6 = vmov 3  }
   0x8   :  { %1454 = vmatpush.msk.msra.mxu0 %vm41_vm0, %v30_v1  ;;  %1456 = vmatpush.msk.msra.mxu1 %vm41_vm0, %v29_v3  ;;  %v33_v5 = vld [vmem:[#allocation2 + $0xb8] sm:$0xff]  ;;  %v1711_v7 = vmov 1   ;;  %v1506_v8 = vld [vmem:[#allocation2 + $0xa8] ss:$0 sm:$0xff]  ;;  %v1712_v11 = vmov 2   ;;  %vm105_vm2 = vcmask 64512  }
   0x9   :  { %1455 = vmatmul.msk.f32.vlgmr.msra.gmra.mxu0 %vm37_vm1, %v28_v2  ;;  %1457 = vmatmul.msk.f32.vlgmr.msra.gmra.mxu1 %vm37_vm1, %v32_v4  ;;  %v1751_v31 = vld [vmem:[#allocation2 + $0x28] sm:$0xff]  ;;  %v1753_v32 = vld [vmem:[#allocation2 + $0x20] sm:$0xff]  ;;  %v1757_v33 = vld [vmem:[#allocation2 + $0x18] sm:$0xff]  ;;  %v1713_v36 = vmov 0.0   ;;  %s1714_s0 = smov 64   ;;  %s1715_s19 = smov 32  }
   0xa   :  { %67 = vperm.xlu0 %1501, %v33_v5   ;;  %1504 = vset.pattern.permute.xlu2 %v1710_v6  ;;  %v1766_v34 = vld [vmem:[#allocation2 + $0x10] sm:$0xff]  ;;  %s1716_s20 = smov [#allocation5]   ;;  %s1444_s24 = sshll.u32 %s2098_s2, 4  ;;  %s1445_s24 = int_to_ptr.hbm [resolvable:$true] %s1444_s24 }
   0xb   :  { %1502 = vset.pattern.permute.xlu1 %v1711_v7  ;;  %283 = vmatpush.msra.mxu2 %v1751_v31  ;;  %s1442_s21 = sshll.u32 %s1716_s20, 4  ;;  %s1443_s21 = int_to_ptr.vmem [resolvable:$true] %s1442_s21 }
   0xc   :  { %346 = vmatpush.msra.mxu3 %v1751_v31  ;;  %483 = vmatpush.msrb.mxu1 %v1751_v31 }
   0xd   :  { %284 = vmatpush.msra.mxu2 %v1753_v32 }
   0xe   :  { %347 = vmatpush.msra.mxu3 %v1753_v32  ;;  %484 = vmatpush.msrb.mxu1 %v1753_v32 }
   0xf   :  { %285 = vmatpush.msra.mxu2 %v1757_v33 }
  0x10   :  { %348 = vmatpush.msra.mxu3 %v1757_v33  ;;  %485 = vmatpush.msrb.mxu1 %v1757_v33 }
  0x11   :  { %286 = vmatpush.msra.mxu2 %v1766_v34 }
  0x12   :  { %349 = vmatpush.msra.mxu3 %v1766_v34  ;;  %287 = vmatmul.f32.vlgmr.msra.gmra.mxu2 %v1713_v36 }
  0x13   :  { %486 = vmatpush.msrb.mxu1 %v1766_v34 }
  0x14   :  { %627 = vmatpush.msrb.mxu3 %v1751_v31 }
  0x16   :  { %628 = vmatpush.msrb.mxu3 %v1753_v32 }
  0x18   :  { %629 = vmatpush.msrb.mxu3 %v1757_v33 }
  0x1a   :  { %630 = vmatpush.msrb.mxu3 %v1766_v34 }
  0x7c   :  { %v68_v12 = vpop.permute.xlu0 %67 }
  0x86   :  { %v62_v9 = vpop.f32.mrf.mxu0  ;;  %v93_v13 = vpop.f32.mrf.mxu1 }
  0x87   :  { %v63_v10 = vadd.f32 %v1506_v8, %v62_v9  ;;  %v1741_v14 = vadd.f32 %v93_v13, %v68_v12 }
  0x89   :  { %215 = vperm.xlu2 %1504, %v63_v10   ;;  %139 = vperm.xlu1 %1502, %v63_v10   ;;  %v142_v15 = vperm.slane %v1741_v14, 1  ;;  %v103_v16 = vperm.slane %v1741_v14, 0  ;;  %v218_v22 = vperm.slane %v1741_v14, 3  ;;  %v180_v26 = vperm.slane %v1741_v14, 2 }
  0x8a   :  { %100 = vperm.xlu0 %1501, %v63_v10   ;;  %v112_v52 = vperm.slane %v1741_v14, 4  ;;  %v226_v59 = vperm.slane %v1741_v14, 7  ;;  %v188_v60 = vperm.slane %v1741_v14, 6  ;;  %v150_v62 = vperm.slane %v1741_v14, 5 }
  0x91   :  { %1503 = vset.pattern.permute.xlu1 %v1712_v11 }
  0x92   :  { %177 = vperm.xlu1 %1503, %v63_v10   ;;  %1505 = vset.pattern.permute.xlu0 %v1710_v6 }
  0xe3   :  { %v216_v24 = vpop.permute.xlu2 %215 }
  0xe4   :  { %v219_v25 = vmul.f32 %v218_v22, %v216_v24 }
  0xe6   :  { %v220_v29 = vsel %vm105_vm2, %v219_v25, -inf }
  0xfb   :  { %v140_v17 = vpop.permute.xlu1 %139 }
  0xfc   :  { %v143_v18 = vmul.f32 %v142_v15, %v140_v17  ;;  %v101_v19 = vpop.permute.xlu0 %100 }
  0xfd   :  { %v104_v20 = vmul.f32 %v103_v16, %v101_v19  ;;  %v1787_v19 = vld [vmem:[#allocation2] sm:$0xf] }
  0xfe   :  { %v144_v21 = vsel %vm105_vm2, %v143_v18, -inf }
  0xff   :  { %145 = vmax.xlane.f32.xlu0 %v144_v21  ;;  %v106_v23 = vsel %vm105_vm2, %v104_v20, -inf }
 0x100   :  { %107 = vmax.xlane.f32.xlu2 %v106_v23 }
 0x104   :  { %v178_v27 = vpop.permute.xlu1 %177 }
 0x105   :  { %v181_v28 = vmul.f32 %v180_v26, %v178_v27 }
 0x107   :  { %v182_v30 = vsel %vm105_vm2, %v181_v28, -inf }
 0x108   :  { %221 = vmax.xlane.f32.xlu2 %v220_v29  ;;  %183 = vmax.xlane.f32.xlu1 %v182_v30 }
 0x172   :  { %v146_v35 = vpop.xlane.xlu0 %145 }
 0x173   :  { %v108_v37 = vpop.xlane.xlu2 %107  ;;  %v147_v38 = vsub.f32 %v143_v18, %v146_v35  ;;  %v135_v35 = vperm.slane %v1787_v19, 0 }
 0x174   :  { %v109_v39 = vsub.f32 %v104_v20, %v108_v37 }
 0x175   :  { %v148_v40 = vmul.f32 1.442695, %v147_v38 }
 0x176   :  { %v110_v41 = vmul.f32 1.442695, %v109_v39 }
 0x177   :  { %1509 = vpow2.f32 %v148_v40 }
 0x178   :  { %1511 = vpow2.f32 %v110_v41 }
 0x17b   :  { %v222_v42 = vpop.xlane.xlu2 %221  ;;  %v184_v43 = vpop.xlane.xlu1 %183 }
 0x17c   :  { %v223_v44 = vsub.f32 %v219_v25, %v222_v42  ;;  %v185_v45 = vsub.f32 %v181_v28, %v184_v43 }
 0x17d   :  { %v1510_v46 = vpop.eup %1509 }
 0x17e   :  { %v1512_v47 = vpop.eup %1511  ;;  %v224_v48 = vmul.f32 1.442695, %v223_v44  ;;  %v186_v49 = vmul.f32 1.442695, %v185_v45  ;;  %v155_v50 = vsel %vm105_vm2, %v1510_v46, 0.0  ;;  %v151_v0 = vmul.f32 %v1510_v46, %v150_v62 }
 0x17f   :  { %v117_v51 = vsel %vm105_vm2, %v1512_v47, 0.0  ;;  %156 = vadd.xlane.f32.xlu0 %v155_v50  ;;  %v113_v53 = vmul.f32 %v1512_v47, %v112_v52 }
 0x180   :  { %1513 = vpow2.f32 %v224_v48  ;;  %118 = vadd.xlane.f32.xlu2 %v117_v51  ;;  %v152_v3 = vsel %vm105_vm2, %v151_v0, 0.0  ;;  %v1507_v48 = vld [vmem:[#allocation2 + $0x8] ss:$0 sm:$0xff] }
 0x181   :  { %1515 = vpow2.f32 %v186_v49  ;;  %v114_v55 = vsel %vm105_vm2, %v113_v53, 0.0  ;;  %v173_v53 = vperm.slane %v1787_v19, 1 }
 0x186   :  { %v1514_v54 = vpop.eup %1513 }
 0x187   :  { %v1516_v56 = vpop.eup %1515  ;;  %v231_v57 = vsel %vm105_vm2, %v1514_v54, 0.0  ;;  %115 = vadd.xlane.f32.xlu0 %v114_v55  ;;  %v227_v61 = vmul.f32 %v1514_v54, %v226_v59 }
 0x188   :  { %232 = vadd.xlane.f32.xlu2 %v231_v57  ;;  %v193_v58 = vsel %vm105_vm2, %v1516_v56, 0.0  ;;  %v189_v63 = vmul.f32 %v1516_v56, %v188_v60 }
 0x189   :  { %194 = vadd.xlane.f32.xlu1 %v193_v58  ;;  %v228_v1 = vsel %vm105_vm2, %v227_v61, 0.0  ;;  %v211_v58 = vperm.slane %v1787_v19, 2 }
 0x18a   :  { %v190_v2 = vsel %vm105_vm2, %v189_v63, 0.0 }
 0x18f   :  { %229 = vadd.xlane.f32.xlu0 %v228_v1 }
 0x190   :  { %191 = vadd.xlane.f32.xlu2 %v190_v2 }
 0x191   :  { %153 = vadd.xlane.f32.xlu1 %v152_v3  ;;  %v249_v3 = vperm.slane %v1787_v19, 3 }
 0x1f2   :  { %v157_v4 = vpop.xlane.xlu0 %156 }
 0x1f3   :  { %v119_v5 = vpop.xlane.xlu2 %118  ;;  %1517 = vrcp.f32 %v157_v4  ;;  %v169_v21 = vand.u32 2147483648, %v157_v4  ;;  %vm163_vm7 = vweird.f32 %v157_v4  ;;  %v167_v24 = vand.u32 2147483647, %v157_v4 }
 0x1f4   :  { %1519 = vrcp.f32 %v119_v5  ;;  %v131_v14 = vand.u32 2147483648, %v119_v5  ;;  %v129_v17 = vand.u32 2147483647, %v119_v5  ;;  %vm125_vm5 = vweird.f32 %v119_v5 }
 0x1f5   :  { %v170_v40 = vor.u32 1.1754944e-38, %v169_v21  ;;  %vm168_vm10 = vcmp.eq.f32.partialorder %v167_v24, 8.507059e+37 }
 0x1f6   :  { %v132_v23 = vor.u32 1.1754944e-38, %v131_v14  ;;  %vm130_vm8 = vcmp.eq.f32.partialorder %v129_v17, 8.507059e+37 }
 0x1f9   :  { %v1518_v6 = vpop.eup %1517 }
 0x1fa   :  { %v1520_v7 = vpop.eup %1519  ;;  %v159_v8 = vmul.f32 %v1518_v6, %v157_v4  ;;  %vm164_vm4 = vweird.f32 %v1518_v6  ;;  %v116_v28 = vpop.xlane.xlu0 %115 }
 0x1fb   :  { %v121_v9 = vmul.f32 %v1520_v7, %v119_v5  ;;  %v233_v10 = vpop.xlane.xlu2 %232  ;;  %vm126_vm3 = vweird.f32 %v1520_v7  ;;  %vm1790_vm9 = vmor %vm163_vm7, %vm164_vm4  ;;  %vm267_vm7 = vcmask 261120  }
 0x1fc   :  { %v160_v11 = vsub.f32 1.0, %v159_v8  ;;  %1521 = vrcp.f32 %v233_v10  ;;  %v195_v12 = vpop.xlane.xlu1 %194  ;;  %vm127_vm6 = vmor %vm125_vm5, %vm126_vm3  ;;  %v243_v42 = vand.u32 2147483647, %v233_v10  ;;  %v245_v43 = vand.u32 2147483648, %v233_v10 }
 0x1fd   :  { %v122_v13 = vsub.f32 1.0, %v121_v9  ;;  %1523 = vrcp.f32 %v195_v12  ;;  %v207_v44 = vand.u32 2147483648, %v195_v12  ;;  %v205_v51 = vand.u32 2147483647, %v195_v12 }
 0x1fe   :  { %v161_v15 = vmul.f32 %v1518_v6, %v160_v11  ;;  %vm239_vm13 = vweird.f32 %v233_v10  ;;  %vm201_vm14 = vweird.f32 %v195_v12  ;;  %v246_v55 = vor.u32 1.1754944e-38, %v245_v43  ;;  %v1835_v43 = vld [vmem:[#allocation2 + $0x38] sm:$0xff] }
 0x1ff   :  { %v123_v16 = vmul.f32 %v1520_v7, %v122_v13  ;;  %v208_v57 = vor.u32 1.1754944e-38, %v207_v44  ;;  %vm244_vm1 = vcmp.eq.f32.partialorder %v243_v42, 8.507059e+37  ;;  %vm206_vm2 = vcmp.eq.f32.partialorder %v205_v51, 8.507059e+37  ;;  %v1830_v42 = vld [vmem:[#allocation2 + $0x40] sm:$0xff] }
 0x200   :  { %v162_v18 = vadd.f32 %v1518_v6, %v161_v15 }
 0x201   :  { %v124_v20 = vadd.f32 %v1520_v7, %v123_v16 }
 0x202   :  { %v1522_v22 = vpop.eup %1521  ;;  %v166_v37 = vsel %vm1790_vm9, %v1518_v6, %v162_v18  ;;  %v230_v1 = vpop.xlane.xlu0 %229 }
 0x203   :  { %v1524_v25 = vpop.eup %1523  ;;  %v235_v26 = vmul.f32 %v1522_v22, %v233_v10  ;;  %v128_v27 = vsel %vm127_vm6, %v1520_v7, %v124_v20  ;;  %vm240_vm11 = vweird.f32 %v1522_v22  ;;  %v171_v46 = vsel %vm168_vm10, %v170_v40, %v166_v37  ;;  %v192_v0 = vpop.xlane.xlu2 %191  ;;  %v1809_v37 = vld [vmem:[#allocation2 + $0x68] sm:$0xff]  ;;  %v1820_v40 = vld [vmem:[#allocation2 + $0x50] sm:$0xff] }
 0x204   :  { %v133_v30 = vsel %vm130_vm8, %v132_v23, %v128_v27  ;;  %v197_v36 = vmul.f32 %v1524_v25, %v195_v12  ;;  %v154_v47 = vpop.xlane.xlu1 %153  ;;  %vm202_vm12 = vweird.f32 %v1524_v25  ;;  %vm241_vm15 = vmor %vm239_vm13, %vm240_vm11  ;;  %v288_v10 = vpop.f32.mrf.mxu2  ;;  %372 = vmatpush.msrb.mxu0 %v1809_v37  ;;  %516 = vmatpush.msrb.mxu2 %v1809_v37  ;;  %vm360_vm8 = vcmask 523264  }
 0x205   :  { %v236_v38 = vsub.f32 1.0, %v235_v26  ;;  %v134_v39 = vmul.f32 %v133_v30, %v116_v28  ;;  %v172_v56 = vmul.f32 %v171_v46, %v154_v47  ;;  %vm203_vm0 = vmor %vm201_vm14, %vm202_vm12  ;;  %660 = vmatpush.msra.mxu1 %v1809_v37  ;;  %v1845_v46 = vld [vmem:[#allocation2 + $0x30] sm:$0xff] }
 0x206   :  { %v198_v41 = vsub.f32 1.0, %v197_v36 }
 0x207   :  { %v237_v45 = vmul.f32 %v1522_v22, %v236_v38  ;;  %v136_v49 = vmul.f32 %v135_v35, %v134_v39  ;;  %v174_v5 = vmul.f32 %v173_v53, %v172_v56  ;;  %v1811_v38 = vld [vmem:[#allocation2 + $0x60] sm:$0xff]  ;;  %v1815_v39 = vld [vmem:[#allocation2 + $0x58] sm:$0xff] }
 0x208   :  { %v199_v50 = vmul.f32 %v1524_v25, %v198_v41  ;;  %373 = vmatpush.msrb.mxu0 %v1811_v38  ;;  %517 = vmatpush.msrb.mxu2 %v1811_v38  ;;  %v1825_v41 = vld [vmem:[#allocation2 + $0x48] sm:$0xff] }
 0x209   :  { %v238_v52 = vadd.f32 %v1522_v22, %v237_v45  ;;  %v137_v60 = vadd.f32 %v1507_v48, %v136_v49  ;;  %661 = vmatpush.msra.mxu1 %v1811_v38  ;;  %v1873_v49 = vld [vmem:[#allocation2 + $0x70] sm:$0x1] }
 0x20a   :  { %v200_v54 = vadd.f32 %v1524_v25, %v199_v50  ;;  %374 = vmatpush.msrb.mxu0 %v1815_v39  ;;  %518 = vmatpush.msrb.mxu2 %v1815_v39 }
 0x20b   :  { %v242_v59 = vsel %vm241_vm15, %v1522_v22, %v238_v52  ;;  %v175_v7 = vadd.f32 %v174_v5, %v137_v60  ;;  %662 = vmatpush.msra.mxu1 %v1815_v39 }
 0x20c   :  { %v204_v61 = vsel %vm203_vm0, %v1524_v25, %v200_v54  ;;  %v247_v62 = vsel %vm244_vm1, %v246_v55, %v242_v59  ;;  %375 = vmatpush.msrb.mxu0 %v1820_v40  ;;  %519 = vmatpush.msrb.mxu2 %v1820_v40 }
 0x20d   :  { %v209_v63 = vsel %vm206_vm2, %v208_v57, %v204_v61  ;;  %v248_v4 = vmul.f32 %v247_v62, %v230_v1  ;;  %663 = vmatpush.msra.mxu1 %v1820_v40 }
 0x20e   :  { %v210_v2 = vmul.f32 %v209_v63, %v192_v0  ;;  %376 = vmatpush.msrb.mxu0 %v1825_v41  ;;  %520 = vmatpush.msrb.mxu2 %v1825_v41 }
 0x20f   :  { %v250_v8 = vmul.f32 %v249_v3, %v248_v4  ;;  %664 = vmatpush.msra.mxu1 %v1825_v41 }
 0x210   :  { %v212_v6 = vmul.f32 %v211_v58, %v210_v2  ;;  %377 = vmatpush.msrb.mxu0 %v1830_v42  ;;  %521 = vmatpush.msrb.mxu2 %v1830_v42 }
 0x211   :  { %665 = vmatpush.msra.mxu1 %v1830_v42 }
 0x212   :  { %v213_v9 = vadd.f32 %v212_v6, %v175_v7  ;;  %378 = vmatpush.msrb.mxu0 %v1835_v43  ;;  %522 = vmatpush.msrb.mxu2 %v1835_v43 }
 0x213   :  { %666 = vmatpush.msra.mxu1 %v1835_v43 }
 0x214   :  { %v1800_v11 = vadd.f32 %v250_v8, %v213_v9  ;;  %379 = vmatpush.msrb.mxu0 %v1845_v46  ;;  %523 = vmatpush.msrb.mxu2 %v1845_v46 }
 0x215   :  { %667 = vmatpush.msra.mxu1 %v1845_v46 }
 0x216   :  { %v291_v12 = vadd.f32 %v288_v10, %v1800_v11  ;;  %804 = vmatpush.msra.mxu0 %v1809_v37  ;;  %915 = vmatpush.msra.mxu2 %v1751_v31 }
 0x218   :  { %1525 = vtanh.f32 %v291_v12  ;;  %v1458_v14 = vmul.f32 -1.442695, %v291_v12  ;;  %805 = vmatpush.msra.mxu0 %v1811_v38  ;;  %916 = vmatpush.msra.mxu2 %v1753_v32 }
 0x21a   :  { %1527 = vpow2.f32 %v1458_v14  ;;  %806 = vmatpush.msra.mxu0 %v1815_v39  ;;  %917 = vmatpush.msra.mxu2 %v1757_v33 }
 0x21c   :  { %807 = vmatpush.msra.mxu0 %v1820_v40  ;;  %918 = vmatpush.msra.mxu2 %v1766_v34 }
 0x21e   :  { %v1526_v13 = vpop.eup %1525  ;;  %808 = vmatpush.msra.mxu0 %v1825_v41 }
 0x21f   :  { %314 = vrot.lane.b32.xlu1 %v1526_v13, %s1714_s0 }
 0x220   :  { %v1528_v15 = vpop.eup %1527  ;;  %809 = vmatpush.msra.mxu0 %v1830_v42 }
 0x221   :  { %v295_v16 = vadd.f32 1.0, %v1528_v15 }
 0x222   :  { %810 = vmatpush.msra.mxu0 %v1835_v43 }
 0x223   :  { %1529 = vrcp.f32 %v295_v16  ;;  %v307_v22 = vand.u32 2147483648, %v295_v16  ;;  %vm301_vm4 = vweird.f32 %v295_v16  ;;  %v305_v23 = vand.u32 2147483647, %v295_v16 }
 0x224   :  { %811 = vmatpush.msra.mxu0 %v1845_v46 }
 0x225   :  { %v308_v25 = vor.u32 1.1754944e-38, %v307_v22  ;;  %vm306_vm6 = vcmp.eq.f32.partialorder %v305_v23, 8.507059e+37 }
 0x229   :  { %v1530_v17 = vpop.eup %1529 }
 0x22a   :  { %v297_v18 = vmul.f32 %v1530_v17, %v295_v16  ;;  %vm302_vm3 = vweird.f32 %v1530_v17 }
 0x22b   :  { %vm303_vm5 = vmor %vm301_vm4, %vm302_vm3 }
 0x22c   :  { %v298_v19 = vsub.f32 1.0, %v297_v18 }
 0x22e   :  { %v299_v20 = vmul.f32 %v1530_v17, %v298_v19 }
 0x230   :  { %v300_v21 = vadd.f32 %v1530_v17, %v299_v20 }
 0x232   :  { %v304_v24 = vsel %vm303_vm5, %v1530_v17, %v300_v21 }
 0x233   :  { %v309_v27 = vsel %vm306_vm6, %v308_v25, %v304_v24 }
 0x234   :  { %v312_v29 = vmul.f32 0.0, %v309_v27 }
 0x291   :  { %v315_v26 = vpop.permute.xlu1 %314 }
 0x292   :  { %v317_v28 = vmul.f32 %v315_v26, %v309_v27 }
 0x294   :  { %319 = vrot.lane.b32.xlu2 %v317_v28, %s1715_s19 }
 0x2ee   :  { %v320_v30 = vpop.permute.xlu2 %319 }
 0x2ef   :  { %v1805_v35 = vadd.f32 %v320_v30, %v312_v29 }
 0x2f1   :  { %1531 = vtanh.f32 %v1805_v35  ;;  %v446_v28 = vrot.slane %v1805_v35, 7 }
 0x2f7   :  { %v1532_v36 = vpop.eup %1531 }
 0x2f8   :  { %325 = vrot.lane.b32.xlu0 %v1532_v36, %s1714_s0 }
 0x36a   :  { %v326_v44 = vpop.permute.xlu0 %325 }
 0x36b   :  { %v328_v45 = vmul.f32 %v326_v44, %v309_v27 }
 0x36d   :  { %330 = vrot.lane.b32.xlu1 %v328_v45, %s1715_s19 }
 0x3df   :  { %v331_v47 = vpop.permute.xlu1 %330 }
 0x3e0   :  { %v359_v48 = vsel %vm267_vm7, %v331_v47, 0.0  ;;  %1459 = vmatmul.msk.f32.vlgmr.msra.gmra.mxu3 %vm267_vm7, %v331_v47 }
 0x3e1   :  { %1460 = vmatmul.msk.f32.vlgmr.msrb.gmra.mxu0 %vm360_vm8, %v359_v48  ;;  %771 = vmatpush.msra.mxu3 %v1751_v31 }
 0x3e2   :  { %1203 = vmatpush.msrb.mxu0 %v1751_v31 }
 0x3e3   :  { %772 = vmatpush.msra.mxu3 %v1753_v32 }
 0x3e4   :  { %1204 = vmatpush.msrb.mxu0 %v1753_v32 }
 0x3e5   :  { %773 = vmatpush.msra.mxu3 %v1757_v33 }
 0x3e6   :  { %1205 = vmatpush.msrb.mxu0 %v1757_v33 }
 0x3e7   :  { %774 = vmatpush.msra.mxu3 %v1766_v34 }
 0x3e8   :  { %1206 = vmatpush.msrb.mxu0 %v1766_v34 }
 0x45e   :  { %v381_v50 = vpop.f32.mrf.mxu0 }
 0x45f   :  { %v384_v51 = vadd.f32 %v381_v50, %v1873_v49 }
 0x461   :  { %1533 = vtanh.f32 %v384_v51  ;;  %v1461_v57 = vmul.f32 -1.442695, %v384_v51 }
 0x463   :  { %v351_v52 = vpop.f32.mrf.mxu3 }
 0x464   :  { %v355_v53 = vrot.slane %v351_v52, 7 }
 0x466   :  { %v357_v54 = vadd.f32 %v355_v53, %v1800_v11 }
 0x467   :  { %v1534_v55 = vpop.eup %1533 }
 0x468   :  { %1535 = vtanh.f32 %v357_v54  ;;  %407 = vrot.lane.b32.xlu2 %v1534_v55, %s1714_s0  ;;  %v1462_v63 = vmul.f32 -1.442695, %v357_v54 }
 0x469   :  { %1537 = vpow2.f32 %v1461_v57 }
 0x46e   :  { %v1536_v56 = vpop.eup %1535 }
 0x46f   :  { %450 = vrot.lane.b32.xlu0 %v1536_v56, %s1714_s0  ;;  %v1538_v58 = vpop.eup %1537 }
 0x470   :  { %v388_v59 = vadd.f32 1.0, %v1538_v58 }
 0x472   :  { %1539 = vrcp.f32 %v388_v59  ;;  %v400_v2 = vand.u32 2147483648, %v388_v59  ;;  %vm394_vm10 = vweird.f32 %v388_v59  ;;  %v398_v3 = vand.u32 2147483647, %v388_v59 }
 0x473   :  { %1541 = vpow2.f32 %v1462_v63 }
 0x474   :  { %v401_v6 = vor.u32 1.1754944e-38, %v400_v2  ;;  %vm399_vm12 = vcmp.eq.f32.partialorder %v398_v3, 8.507059e+37 }
 0x478   :  { %v1540_v60 = vpop.eup %1539 }
 0x479   :  { %v390_v61 = vmul.f32 %v1540_v60, %v388_v59  ;;  %vm395_vm9 = vweird.f32 %v1540_v60  ;;  %v1542_v4 = vpop.eup %1541 }
 0x47a   :  { %vm396_vm11 = vmor %vm394_vm10, %vm395_vm9  ;;  %v428_v7 = vadd.f32 1.0, %v1542_v4 }
 0x47b   :  { %v391_v62 = vsub.f32 1.0, %v390_v61 }
 0x47c   :  { %1543 = vrcp.f32 %v428_v7  ;;  %v440_v17 = vand.u32 2147483648, %v428_v7  ;;  %vm434_vm14 = vweird.f32 %v428_v7  ;;  %v438_v18 = vand.u32 2147483647, %v428_v7 }
 0x47d   :  { %v392_v0 = vmul.f32 %v1540_v60, %v391_v62 }
 0x47e   :  { %v441_v20 = vor.u32 1.1754944e-38, %v440_v17  ;;  %vm439_vm0 = vcmp.eq.f32.partialorder %v438_v18, 8.507059e+37 }
 0x47f   :  { %v393_v1 = vadd.f32 %v1540_v60, %v392_v0 }
 0x481   :  { %v397_v5 = vsel %vm396_vm11, %v1540_v60, %v393_v1 }
 0x482   :  { %v402_v9 = vsel %vm399_vm12, %v401_v6, %v397_v5  ;;  %v1544_v12 = vpop.eup %1543 }
 0x483   :  { %v430_v13 = vmul.f32 %v1544_v12, %v428_v7  ;;  %vm435_vm13 = vweird.f32 %v1544_v12  ;;  %v405_v24 = vmul.f32 0.0, %v402_v9 }
 0x484   :  { %vm436_vm15 = vmor %vm434_vm14, %vm435_vm13 }
 0x485   :  { %v431_v14 = vsub.f32 1.0, %v430_v13 }
 0x487   :  { %v432_v15 = vmul.f32 %v1544_v12, %v431_v14 }
 0x489   :  { %v433_v16 = vadd.f32 %v1544_v12, %v432_v15 }
 0x48b   :  { %v437_v19 = vsel %vm436_vm15, %v1544_v12, %v433_v16 }
 0x48c   :  { %v442_v22 = vsel %vm439_vm0, %v441_v20, %v437_v19 }
 0x48d   :  { %v448_v29 = vmul.f32 %v446_v28, %v442_v22 }
 0x4c2   :  { %v408_v8 = vpop.permute.xlu2 %407 }
 0x4c3   :  { %v410_v10 = vmul.f32 %v408_v8, %v402_v9 }
 0x4c5   :  { %412 = vrot.lane.b32.xlu0 %v410_v10, %s1715_s19 }
 0x4e1   :  { %v451_v21 = vpop.permute.xlu0 %450 }
 0x4e2   :  { %v453_v23 = vmul.f32 %v451_v21, %v442_v22 }
 0x4e4   :  { %455 = vrot.lane.b32.xlu1 %v453_v23, %s1715_s19 }
 0x537   :  { %v413_v25 = vpop.permute.xlu0 %412 }
 0x538   :  { %v1881_v26 = vadd.f32 %v413_v25, %v405_v24 }
 0x53a   :  { %1545 = vtanh.f32 %v1881_v26 }
 0x540   :  { %v1546_v27 = vpop.eup %1545 }
 0x541   :  { %418 = vrot.lane.b32.xlu1 %v1546_v27, %s1714_s0 }
 0x556   :  { %v456_v30 = vpop.permute.xlu1 %455 }
 0x557   :  { %v1886_v36 = vadd.f32 %v456_v30, %v448_v29 }
 0x559   :  { %1547 = vtanh.f32 %v1886_v36 }
 0x55f   :  { %v1548_v44 = vpop.eup %1547 }
 0x560   :  { %461 = vrot.lane.b32.xlu2 %v1548_v44, %s1714_s0 }
 0x5b3   :  { %v419_v45 = vpop.permute.xlu1 %418 }
 0x5b4   :  { %v1890_v47 = vmul.f32 %v419_v45, %v402_v9  ;;  %v590_v45 = vrot.slane %v1886_v36, 7 }
 0x5b6   :  { %v499_v48 = vrot.slane %v1890_v47, 7 }
 0x5b8   :  { %500 = vrot.lane.b32.xlu1 %v499_v48, %s1714_s0 }
 0x5ba   :  { %v462_v50 = vpop.permute.xlu2 %461 }
 0x5bb   :  { %v464_v51 = vmul.f32 %v462_v50, %v442_v22 }
 0x5bd   :  { %v466_v52 = vrot.slane %v464_v51, 1  ;;  %495 = vrot.lane.b32.xlu2 %v464_v51, %s1715_s19 }
 0x5bf   :  { %467 = vrot.lane.b32.xlu0 %v466_v52, %s1715_s19 }
 0x617   :  { %v496_v35 = vpop.permute.xlu2 %495 }
 0x62a   :  { %v501_v53 = vpop.permute.xlu1 %500 }
 0x62b   :  { %v503_v54 = vsel %vm267_vm7, %v496_v35, %v501_v53 }
 0x62c   :  { %v505_v55 = vrot.slane %v503_v54, 1  ;;  %v423_v54 = vperm.slane %v1890_v47, 0 }
 0x62e   :  { %1464 = vmatmul.msk.f32.vlgmr.msrb.gmra.mxu2 %vm360_vm8, %v505_v55 }
 0x62f   :  { %1092 = vmatpush.msrb.mxu2 %v1809_v37 }
 0x631   :  { %v468_v56 = vpop.permute.xlu0 %467  ;;  %1093 = vmatpush.msrb.mxu2 %v1811_v38 }
 0x632   :  { %1463 = vmatmul.msk.f32.vlgmr.msrb.gmra.mxu1 %vm267_vm7, %v468_v56 }
 0x633   :  { %1094 = vmatpush.msrb.mxu2 %v1815_v39  ;;  %1059 = vmatpush.msrb.mxu1 %v1751_v31 }
 0x635   :  { %1095 = vmatpush.msrb.mxu2 %v1820_v40  ;;  %1060 = vmatpush.msrb.mxu1 %v1753_v32 }
 0x637   :  { %1096 = vmatpush.msrb.mxu2 %v1825_v41  ;;  %1061 = vmatpush.msrb.mxu1 %v1757_v33 }
 0x639   :  { %1097 = vmatpush.msrb.mxu2 %v1830_v42  ;;  %1062 = vmatpush.msrb.mxu1 %v1766_v34 }
 0x63b   :  { %1098 = vmatpush.msrb.mxu2 %v1835_v43 }
 0x63d   :  { %1099 = vmatpush.msrb.mxu2 %v1845_v46 }
 0x6af   :  { %v488_v57 = vpop.f32.mrf.mxu1 }
 0x6b0   :  { %v492_v58 = vrot.slane %v488_v57, 6 }
 0x6b1   :  { %v525_v59 = vpop.f32.mrf.mxu2 }
 0x6b2   :  { %v494_v31 = vadd.f32 %v492_v58, %v1800_v11  ;;  %v528_v60 = vadd.f32 %v525_v59, %v1873_v49 }
 0x6b4   :  { %1549 = vtanh.f32 %v494_v31  ;;  %v1465_v33 = vmul.f32 -1.442695, %v528_v60  ;;  %v1466_v0 = vmul.f32 -1.442695, %v494_v31 }
 0x6b5   :  { %1551 = vtanh.f32 %v528_v60 }
 0x6b6   :  { %1553 = vpow2.f32 %v1465_v33 }
 0x6ba   :  { %v1550_v32 = vpop.eup %1549 }
 0x6bb   :  { %v1552_v61 = vpop.eup %1551  ;;  %594 = vrot.lane.b32.xlu0 %v1550_v32, %s1714_s0 }
 0x6bc   :  { %551 = vrot.lane.b32.xlu2 %v1552_v61, %s1714_s0  ;;  %v1554_v34 = vpop.eup %1553 }
 0x6bd   :  { %v532_v62 = vadd.f32 1.0, %v1554_v34 }
 0x6bf   :  { %1555 = vrcp.f32 %v532_v62  ;;  %v544_v7 = vand.u32 2147483648, %v532_v62  ;;  %vm538_vm2 = vweird.f32 %v532_v62  ;;  %v542_v8 = vand.u32 2147483647, %v532_v62 }
 0x6c0   :  { %1557 = vpow2.f32 %v1466_v0 }
 0x6c1   :  { %v545_v10 = vor.u32 1.1754944e-38, %v544_v7  ;;  %vm543_vm4 = vcmp.eq.f32.partialorder %v542_v8, 8.507059e+37 }
 0x6c5   :  { %v1556_v63 = vpop.eup %1555 }
 0x6c6   :  { %v534_v1 = vmul.f32 %v1556_v63, %v532_v62  ;;  %v1558_v3 = vpop.eup %1557  ;;  %vm539_vm1 = vweird.f32 %v1556_v63 }
 0x6c7   :  { %v572_v5 = vadd.f32 1.0, %v1558_v3  ;;  %vm540_vm3 = vmor %vm538_vm2, %vm539_vm1 }
 0x6c8   :  { %v535_v2 = vsub.f32 1.0, %v534_v1 }
 0x6c9   :  { %1559 = vrcp.f32 %v572_v5  ;;  %v584_v20 = vand.u32 2147483648, %v572_v5  ;;  %vm578_vm6 = vweird.f32 %v572_v5  ;;  %v582_v21 = vand.u32 2147483647, %v572_v5 }
 0x6ca   :  { %v536_v4 = vmul.f32 %v1556_v63, %v535_v2 }
 0x6cb   :  { %v585_v23 = vor.u32 1.1754944e-38, %v584_v20  ;;  %vm583_vm10 = vcmp.eq.f32.partialorder %v582_v21, 8.507059e+37 }
 0x6cc   :  { %v537_v6 = vadd.f32 %v1556_v63, %v536_v4 }
 0x6ce   :  { %v541_v9 = vsel %vm540_vm3, %v1556_v63, %v537_v6 }
 0x6cf   :  { %v546_v13 = vsel %vm543_vm4, %v545_v10, %v541_v9  ;;  %v1560_v14 = vpop.eup %1559 }
 0x6d0   :  { %v574_v16 = vmul.f32 %v1560_v14, %v572_v5  ;;  %vm579_vm5 = vweird.f32 %v1560_v14  ;;  %v549_v28 = vmul.f32 %v546_v13, %v1881_v26  ;;  %v265_v26 = vlaneseq }
 0x6d1   :  { %vm580_vm9 = vmor %vm578_vm6, %vm579_vm5 }
 0x6d2   :  { %v575_v17 = vsub.f32 1.0, %v574_v16  ;;  %v1927_v35 = vshrl.u32 %v265_v26, 7 }
 0x6d4   :  { %v576_v18 = vmul.f32 %v1560_v14, %v575_v17  ;;  %vm422_vm11 = vcmp.eq.s32.totalorder %v1927_v35, 0  ;;  %vm566_vm12 = vcmp.eq.s32.totalorder %v1927_v35, 1  ;;  %vm710_vm5 = vcmp.eq.s32.totalorder %v1927_v35, 2 }
 0x6d5   :  { %v424_v31 = vsel %vm422_vm11, %v423_v54, 0.0 }
 0x6d6   :  { %v577_v19 = vadd.f32 %v1560_v14, %v576_v18 }
 0x6d8   :  { %v581_v22 = vsel %vm580_vm9, %v1560_v14, %v577_v19 }
 0x6d9   :  { %v586_v25 = vsel %vm583_vm10, %v585_v23, %v581_v22 }
 0x6da   :  { %v592_v48 = vmul.f32 %v590_v45, %v586_v25 }
 0x716   :  { %v552_v12 = vpop.permute.xlu2 %551 }
 0x717   :  { %v554_v15 = vmul.f32 %v552_v12, %v546_v13 }
 0x719   :  { %556 = vrot.lane.b32.xlu0 %v554_v15, %s1715_s19 }
 0x72d   :  { %v595_v24 = vpop.permute.xlu0 %594 }
 0x72e   :  { %v597_v27 = vmul.f32 %v595_v24, %v586_v25 }
 0x730   :  { %599 = vrot.lane.b32.xlu1 %v597_v27, %s1715_s19 }
 0x78b   :  { %v557_v29 = vpop.permute.xlu0 %556 }
 0x78c   :  { %v1918_v30 = vadd.f32 %v557_v29, %v549_v28 }
 0x78e   :  { %1561 = vtanh.f32 %v1918_v30 }
 0x794   :  { %v1562_v44 = vpop.eup %1561 }
 0x795   :  { %562 = vrot.lane.b32.xlu1 %v1562_v44, %s1714_s0 }
 0x7a2   :  { %v600_v50 = vpop.permute.xlu1 %599 }
 0x7a3   :  { %v1923_v51 = vadd.f32 %v600_v50, %v592_v48 }
 0x7a5   :  { %1563 = vtanh.f32 %v1923_v51 }
 0x7ab   :  { %v1564_v52 = vpop.eup %1563 }
 0x7ac   :  { %605 = vrot.lane.b32.xlu2 %v1564_v52, %s1714_s0 }
 0x806   :  { %v606_v53 = vpop.permute.xlu2 %605 }
 0x807   :  { %v608_v55 = vmul.f32 %v606_v53, %v586_v25  ;;  %v563_v56 = vpop.permute.xlu1 %562 }
 0x808   :  { %v565_v36 = vmul.f32 %v563_v56, %v546_v13 }
 0x809   :  { %v610_v57 = vrot.slane %v608_v55, 2  ;;  %639 = vrot.lane.b32.xlu2 %v608_v55, %s1715_s19 }
 0x80a   :  { %v567_v58 = vperm.slane %v565_v36, 0  ;;  %v643_v59 = vrot.slane %v565_v36, 6 }
 0x80b   :  { %611 = vrot.lane.b32.xlu0 %v610_v57, %s1715_s19  ;;  %v734_v57 = vrot.slane %v1923_v51, 7 }
 0x80c   :  { %v1934_v60 = vsel %vm566_vm12, %v567_v58, %v424_v31  ;;  %644 = vrot.lane.b32.xlu1 %v643_v59, %s1714_s0 }
 0x863   :  { %v640_v32 = vpop.permute.xlu2 %639 }
 0x87d   :  { %v612_v47 = vpop.permute.xlu0 %611 }
 0x87e   :  { %v645_v61 = vpop.permute.xlu1 %644  ;;  %1467 = vmatmul.msk.f32.vlgmr.msrb.gmra.mxu3 %vm267_vm7, %v612_v47 }
 0x87f   :  { %v647_v33 = vsel %vm267_vm7, %v640_v32, %v645_v61  ;;  %948 = vmatpush.msrb.mxu3 %v1809_v37 }
 0x880   :  { %v649_v34 = vrot.slane %v647_v33, 2 }
 0x881   :  { %949 = vmatpush.msrb.mxu3 %v1811_v38 }
 0x882   :  { %1468 = vmatmul.msk.f32.vlgmr.msra.gmra.mxu1 %vm360_vm8, %v649_v34 }
 0x883   :  { %950 = vmatpush.msrb.mxu3 %v1815_v39  ;;  %1236 = vmatpush.msra.mxu1 %v1809_v37 }
 0x885   :  { %951 = vmatpush.msrb.mxu3 %v1820_v40  ;;  %1237 = vmatpush.msra.mxu1 %v1811_v38 }
 0x887   :  { %952 = vmatpush.msrb.mxu3 %v1825_v41  ;;  %1238 = vmatpush.msra.mxu1 %v1815_v39 }
 0x889   :  { %953 = vmatpush.msrb.mxu3 %v1830_v42  ;;  %1239 = vmatpush.msra.mxu1 %v1820_v40 }
 0x88b   :  { %954 = vmatpush.msrb.mxu3 %v1835_v43  ;;  %1240 = vmatpush.msra.mxu1 %v1825_v41 }
 0x88d   :  { %955 = vmatpush.msrb.mxu3 %v1845_v46  ;;  %1241 = vmatpush.msra.mxu1 %v1830_v42 }
 0x88f   :  { %1242 = vmatpush.msra.mxu1 %v1835_v43 }
 0x891   :  { %1243 = vmatpush.msra.mxu1 %v1845_v46 }
 0x8ff   :  { %v669_v62 = vpop.f32.mrf.mxu1 }
 0x900   :  { %v672_v63 = vadd.f32 %v669_v62, %v1873_v49 }
 0x901   :  { %v632_v0 = vpop.f32.mrf.mxu3 }
 0x902   :  { %1565 = vtanh.f32 %v672_v63  ;;  %v636_v1 = vrot.slane %v632_v0, 5  ;;  %v1469_v5 = vmul.f32 -1.442695, %v672_v63 }
 0x904   :  { %v638_v2 = vadd.f32 %v636_v1, %v1800_v11 }
 0x906   :  { %1567 = vtanh.f32 %v638_v2  ;;  %v1470_v10 = vmul.f32 -1.442695, %v638_v2 }
 0x907   :  { %1569 = vpow2.f32 %v1469_v5 }
 0x908   :  { %v1566_v3 = vpop.eup %1565 }
 0x909   :  { %695 = vrot.lane.b32.xlu2 %v1566_v3, %s1714_s0 }
 0x90c   :  { %v1568_v4 = vpop.eup %1567 }
 0x90d   :  { %738 = vrot.lane.b32.xlu0 %v1568_v4, %s1714_s0  ;;  %v1570_v6 = vpop.eup %1569 }
 0x90e   :  { %v676_v7 = vadd.f32 1.0, %v1570_v6 }
 0x910   :  { %1571 = vrcp.f32 %v676_v7  ;;  %v688_v16 = vand.u32 2147483648, %v676_v7  ;;  %vm682_vm14 = vweird.f32 %v676_v7  ;;  %v686_v17 = vand.u32 2147483647, %v676_v7 }
 0x911   :  { %1573 = vpow2.f32 %v1470_v10 }
 0x912   :  { %v689_v20 = vor.u32 1.1754944e-38, %v688_v16  ;;  %vm687_vm0 = vcmp.eq.f32.partialorder %v686_v17, 8.507059e+37 }
 0x916   :  { %v1572_v8 = vpop.eup %1571 }
 0x917   :  { %v678_v9 = vmul.f32 %v1572_v8, %v676_v7  ;;  %v1574_v14 = vpop.eup %1573  ;;  %vm683_vm13 = vweird.f32 %v1572_v8 }
 0x918   :  { %v716_v18 = vadd.f32 1.0, %v1574_v14  ;;  %vm684_vm15 = vmor %vm682_vm14, %vm683_vm13 }
 0x919   :  { %v679_v12 = vsub.f32 1.0, %v678_v9 }
 0x91a   :  { %1575 = vrcp.f32 %v716_v18  ;;  %v728_v44 = vand.u32 2147483648, %v716_v18  ;;  %vm722_vm2 = vweird.f32 %v716_v18  ;;  %v726_v45 = vand.u32 2147483647, %v716_v18 }
 0x91b   :  { %v680_v13 = vmul.f32 %v1572_v8, %v679_v12 }
 0x91c   :  { %v729_v50 = vor.u32 1.1754944e-38, %v728_v44  ;;  %vm727_vm4 = vcmp.eq.f32.partialorder %v726_v45, 8.507059e+37 }
 0x91d   :  { %v681_v15 = vadd.f32 %v1572_v8, %v680_v13 }
 0x91f   :  { %v685_v19 = vsel %vm684_vm15, %v1572_v8, %v681_v15 }
 0x920   :  { %v690_v22 = vsel %vm687_vm0, %v689_v20, %v685_v19  ;;  %v1576_v24 = vpop.eup %1575  ;;  %vm854_vm0 = vcmp.eq.s32.totalorder %v1927_v35, 3 }
 0x921   :  { %v718_v25 = vmul.f32 %v1576_v24, %v716_v18  ;;  %vm723_vm1 = vweird.f32 %v1576_v24  ;;  %v693_v54 = vmul.f32 %v690_v22, %v1918_v30 }
 0x922   :  { %vm724_vm3 = vmor %vm722_vm2, %vm723_vm1 }
 0x923   :  { %v719_v27 = vsub.f32 1.0, %v718_v25 }
 0x925   :  { %v720_v28 = vmul.f32 %v1576_v24, %v719_v27 }
 0x927   :  { %v721_v29 = vadd.f32 %v1576_v24, %v720_v28 }
 0x929   :  { %v725_v48 = vsel %vm724_vm3, %v1576_v24, %v721_v29 }
 0x92a   :  { %v730_v26 = vsel %vm727_vm4, %v729_v50, %v725_v48 }
 0x92b   :  { %v736_v58 = vmul.f32 %v734_v57, %v730_v26 }
 0x963   :  { %v696_v21 = vpop.permute.xlu2 %695 }
 0x964   :  { %v698_v23 = vmul.f32 %v696_v21, %v690_v22 }
 0x966   :  { %700 = vrot.lane.b32.xlu0 %v698_v23, %s1715_s19 }
 0x97f   :  { %v739_v52 = vpop.permute.xlu0 %738 }
 0x980   :  { %v741_v53 = vmul.f32 %v739_v52, %v730_v26 }
 0x982   :  { %743 = vrot.lane.b32.xlu1 %v741_v53, %s1715_s19 }
 0x9d8   :  { %v701_v55 = vpop.permute.xlu0 %700 }
 0x9d9   :  { %v1963_v56 = vadd.f32 %v701_v55, %v693_v54 }
 0x9db   :  { %1577 = vtanh.f32 %v1963_v56 }
 0x9e1   :  { %v1578_v36 = vpop.eup %1577 }
 0x9e2   :  { %706 = vrot.lane.b32.xlu1 %v1578_v36, %s1714_s0 }
 0x9f4   :  { %v744_v59 = vpop.permute.xlu1 %743 }
 0x9f5   :  { %v1968_v31 = vadd.f32 %v744_v59, %v736_v58 }
 0x9f7   :  { %1579 = vtanh.f32 %v1968_v31 }
 0x9fd   :  { %v1580_v47 = vpop.eup %1579 }
 0x9fe   :  { %749 = vrot.lane.b32.xlu2 %v1580_v47, %s1714_s0 }
 0xa54   :  { %v707_v30 = vpop.permute.xlu1 %706 }
 0xa55   :  { %v709_v32 = vmul.f32 %v707_v30, %v690_v22 }
 0xa57   :  { %v711_v61 = vperm.slane %v709_v32, 0  ;;  %v787_v33 = vrot.slane %v709_v32, 5 }
 0xa58   :  { %v750_v34 = vpop.permute.xlu2 %749 }
 0xa59   :  { %v1974_v62 = vsel %vm710_vm5, %v711_v61, %v1934_v60  ;;  %v752_v51 = vmul.f32 %v750_v34, %v730_v26  ;;  %788 = vrot.lane.b32.xlu1 %v787_v33, %s1714_s0  ;;  %v878_v26 = vrot.slane %v1968_v31, 7 }
 0xa5b   :  { %v754_v63 = vrot.slane %v752_v51, 3  ;;  %783 = vrot.lane.b32.xlu2 %v752_v51, %s1715_s19 }
 0xa5d   :  { %755 = vrot.lane.b32.xlu0 %v754_v63, %s1715_s19 }
 0xab5   :  { %v784_v0 = vpop.permute.xlu2 %783 }
 0xacb   :  { %v789_v1 = vpop.permute.xlu1 %788 }
 0xacc   :  { %v791_v2 = vsel %vm267_vm7, %v784_v0, %v789_v1 }
 0xacd   :  { %v793_v3 = vrot.slane %v791_v2, 3 }
 0xacf   :  { %1472 = vmatmul.msk.f32.vlgmr.msra.gmra.mxu0 %vm360_vm8, %v793_v3  ;;  %v756_v4 = vpop.permute.xlu0 %755 }
 0xad0   :  { %1471 = vmatmul.msk.f32.vlgmr.msra.gmra.mxu3 %vm267_vm7, %v756_v4 }
 0xad1   :  { %1351 = vmatpush.msra.mxu3 %v1809_v37 }
 0xad3   :  { %1352 = vmatpush.msra.mxu3 %v1811_v38 }
 0xad5   :  { %1353 = vmatpush.msra.mxu3 %v1815_v39 }
 0xad7   :  { %1354 = vmatpush.msra.mxu3 %v1820_v40 }
 0xad9   :  { %1355 = vmatpush.msra.mxu3 %v1825_v41 }
 0xadb   :  { %1356 = vmatpush.msra.mxu3 %v1830_v42 }
 0xadd   :  { %1357 = vmatpush.msra.mxu3 %v1835_v43 }
 0xadf   :  { %1358 = vmatpush.msra.mxu3 %v1845_v46 }
 0xb4c   :  { %v813_v60 = vpop.f32.mrf.mxu0 }
 0xb4d   :  { %v816_v5 = vadd.f32 %v813_v60, %v1873_v49 }
 0xb4f   :  { %1581 = vtanh.f32 %v816_v5  ;;  %v1473_v43 = vmul.f32 -1.442695, %v816_v5 }
 0xb53   :  { %v776_v6 = vpop.f32.mrf.mxu3 }
 0xb54   :  { %v780_v37 = vrot.slane %v776_v6, 4 }
 0xb55   :  { %v1582_v7 = vpop.eup %1581 }
 0xb56   :  { %v782_v38 = vadd.f32 %v780_v37, %v1800_v11  ;;  %839 = vrot.lane.b32.xlu0 %v1582_v7, %s1714_s0 }
 0xb58   :  { %1583 = vtanh.f32 %v782_v38  ;;  %v1474_v40 = vmul.f32 -1.442695, %v782_v38 }
 0xb5a   :  { %1585 = vpow2.f32 %v1474_v40 }
 0xb5e   :  { %v1584_v39 = vpop.eup %1583 }
 0xb5f   :  { %882 = vrot.lane.b32.xlu2 %v1584_v39, %s1714_s0 }
 0xb60   :  { %v1586_v41 = vpop.eup %1585 }
 0xb61   :  { %v860_v42 = vadd.f32 1.0, %v1586_v41 }
 0xb63   :  { %1587 = vrcp.f32 %v860_v42  ;;  %v872_v16 = vand.u32 2147483648, %v860_v42  ;;  %vm866_vm9 = vweird.f32 %v860_v42  ;;  %v870_v17 = vand.u32 2147483647, %v860_v42 }
 0xb64   :  { %1589 = vpow2.f32 %v1473_v43 }
 0xb65   :  { %v873_v20 = vor.u32 1.1754944e-38, %v872_v16  ;;  %vm871_vm11 = vcmp.eq.f32.partialorder %v870_v17, 8.507059e+37 }
 0xb69   :  { %v1588_v46 = vpop.eup %1587 }
 0xb6a   :  { %v1590_v8 = vpop.eup %1589  ;;  %v862_v9 = vmul.f32 %v1588_v46, %v860_v42  ;;  %vm867_vm6 = vweird.f32 %v1588_v46 }
 0xb6b   :  { %v820_v10 = vadd.f32 1.0, %v1590_v8  ;;  %vm868_vm10 = vmor %vm866_vm9, %vm867_vm6 }
 0xb6c   :  { %v863_v12 = vsub.f32 1.0, %v862_v9 }
 0xb6d   :  { %1591 = vrcp.f32 %v820_v10  ;;  %v832_v28 = vand.u32 2147483648, %v820_v10  ;;  %vm826_vm13 = vweird.f32 %v820_v10  ;;  %v830_v29 = vand.u32 2147483647, %v820_v10 }
 0xb6e   :  { %v864_v13 = vmul.f32 %v1588_v46, %v863_v12 }
 0xb6f   :  { %v833_v45 = vor.u32 1.1754944e-38, %v832_v28  ;;  %vm831_vm15 = vcmp.eq.f32.partialorder %v830_v29, 8.507059e+37 }
 0xb70   :  { %v865_v15 = vadd.f32 %v1588_v46, %v864_v13 }
 0xb72   :  { %v869_v19 = vsel %vm868_vm10, %v1588_v46, %v865_v15 }
 0xb73   :  { %v1592_v14 = vpop.eup %1591  ;;  %v874_v22 = vsel %vm871_vm11, %v873_v20, %v869_v19  ;;  %vm998_vm11 = vcmp.eq.s32.totalorder %v1927_v35, 4 }
 0xb74   :  { %v822_v18 = vmul.f32 %v1592_v14, %v820_v10  ;;  %vm827_vm12 = vweird.f32 %v1592_v14  ;;  %v880_v53 = vmul.f32 %v878_v26, %v874_v22 }
 0xb75   :  { %vm828_vm14 = vmor %vm826_vm13, %vm827_vm12 }
 0xb76   :  { %v823_v23 = vsub.f32 1.0, %v822_v18 }
 0xb78   :  { %v824_v25 = vmul.f32 %v1592_v14, %v823_v23 }
 0xb7a   :  { %v825_v27 = vadd.f32 %v1592_v14, %v824_v25 }
 0xb7c   :  { %v829_v44 = vsel %vm828_vm14, %v1592_v14, %v825_v27 }
 0xb7d   :  { %v834_v50 = vsel %vm831_vm15, %v833_v45, %v829_v44 }
 0xb7e   :  { %v837_v57 = vmul.f32 %v834_v50, %v1963_v56 }
 0xbb9   :  { %v883_v21 = vpop.permute.xlu2 %882 }
 0xbba   :  { %v885_v24 = vmul.f32 %v883_v21, %v874_v22 }
 0xbbc   :  { %887 = vrot.lane.b32.xlu0 %v885_v24, %s1715_s19 }
 0xbc8   :  { %v840_v48 = vpop.permute.xlu0 %839 }
 0xbc9   :  { %v842_v52 = vmul.f32 %v840_v48, %v834_v50 }
 0xbcb   :  { %844 = vrot.lane.b32.xlu1 %v842_v52, %s1715_s19 }
 0xc2e   :  { %v888_v54 = vpop.permute.xlu0 %887 }
 0xc2f   :  { %v1997_v55 = vadd.f32 %v888_v54, %v880_v53 }
 0xc31   :  { %1593 = vtanh.f32 %v1997_v55 }
 0xc37   :  { %v1594_v36 = vpop.eup %1593 }
 0xc38   :  { %893 = vrot.lane.b32.xlu1 %v1594_v36, %s1714_s0 }
 0xc3d   :  { %v845_v58 = vpop.permute.xlu1 %844 }
 0xc3e   :  { %v2002_v59 = vadd.f32 %v845_v58, %v837_v57 }
 0xc40   :  { %1595 = vtanh.f32 %v2002_v59 }
 0xc46   :  { %v1596_v47 = vpop.eup %1595 }
 0xc47   :  { %850 = vrot.lane.b32.xlu2 %v1596_v47, %s1714_s0 }
 0xca1   :  { %v851_v31 = vpop.permute.xlu2 %850 }
 0xca2   :  { %v853_v30 = vmul.f32 %v851_v31, %v834_v50  ;;  %v1022_v50 = vrot.slane %v1997_v55, 7 }
 0xca4   :  { %v855_v32 = vperm.slane %v853_v30, 0  ;;  %v931_v61 = vrot.slane %v853_v30, 4 }
 0xca6   :  { %v2008_v33 = vsel %vm854_vm0, %v855_v32, %v1974_v62  ;;  %932 = vrot.lane.b32.xlu2 %v931_v61, %s1714_s0 }
 0xcaa   :  { %v894_v56 = vpop.permute.xlu1 %893 }
 0xcab   :  { %v896_v34 = vmul.f32 %v894_v56, %v874_v22 }
 0xcad   :  { %v898_v51 = vrot.slane %v896_v34, 4  ;;  %927 = vrot.lane.b32.xlu0 %v896_v34, %s1715_s19 }
 0xcaf   :  { %899 = vrot.lane.b32.xlu1 %v898_v51, %s1715_s19 }
 0xd00   :  { %v933_v63 = vpop.permute.xlu2 %932 }
 0xd1f   :  { %v928_v0 = vpop.permute.xlu0 %927 }
 0xd20   :  { %v935_v1 = vsel %vm267_vm7, %v928_v0, %v933_v63 }
 0xd21   :  { %v937_v2 = vrot.slane %v935_v1, 4  ;;  %v900_v3 = vpop.permute.xlu1 %899 }
 0xd22   :  { %1475 = vmatmul.msk.f32.vlgmr.msra.gmra.mxu2 %vm267_vm7, %v900_v3 }
 0xd23   :  { %1476 = vmatmul.msk.f32.vlgmr.msrb.gmra.mxu3 %vm360_vm8, %v937_v2 }
 0xda5   :  { %v920_v62 = vpop.f32.mrf.mxu2 }
 0xda6   :  { %v924_v4 = vrot.slane %v920_v62, 3  ;;  %v957_v60 = vpop.f32.mrf.mxu3 }
 0xda7   :  { %v960_v5 = vadd.f32 %v957_v60, %v1873_v49 }
 0xda8   :  { %v926_v6 = vadd.f32 %v924_v4, %v1800_v11 }
 0xda9   :  { %1597 = vtanh.f32 %v960_v5  ;;  %v1477_v42 = vmul.f32 -1.442695, %v960_v5 }
 0xdaa   :  { %1599 = vtanh.f32 %v926_v6  ;;  %v1478_v38 = vmul.f32 -1.442695, %v926_v6 }
 0xdac   :  { %1601 = vpow2.f32 %v1478_v38 }
 0xdaf   :  { %v1598_v37 = vpop.eup %1597 }
 0xdb0   :  { %v1600_v7 = vpop.eup %1599  ;;  %983 = vrot.lane.b32.xlu0 %v1598_v37, %s1714_s0 }
 0xdb1   :  { %1026 = vrot.lane.b32.xlu2 %v1600_v7, %s1714_s0 }
 0xdb2   :  { %v1602_v39 = vpop.eup %1601 }
 0xdb3   :  { %v1004_v40 = vadd.f32 1.0, %v1602_v39 }
 0xdb5   :  { %1603 = vrcp.f32 %v1004_v40  ;;  %v1016_v13 = vand.u32 2147483648, %v1004_v40  ;;  %vm1010_vm2 = vweird.f32 %v1004_v40  ;;  %v1014_v14 = vand.u32 2147483647, %v1004_v40 }
 0xdb6   :  { %1605 = vpow2.f32 %v1477_v42 }
 0xdb7   :  { %v1017_v16 = vor.u32 1.1754944e-38, %v1016_v13  ;;  %vm1015_vm4 = vcmp.eq.f32.partialorder %v1014_v14, 8.507059e+37 }
 0xdbb   :  { %v1604_v41 = vpop.eup %1603 }
 0xdbc   :  { %v1006_v43 = vmul.f32 %v1604_v41, %v1004_v40  ;;  %v1606_v8 = vpop.eup %1605  ;;  %vm1011_vm1 = vweird.f32 %v1604_v41 }
 0xdbd   :  { %v964_v10 = vadd.f32 1.0, %v1606_v8  ;;  %vm1012_vm3 = vmor %vm1010_vm2, %vm1011_vm1 }
 0xdbe   :  { %v1007_v46 = vsub.f32 1.0, %v1006_v43 }
 0xdbf   :  { %1607 = vrcp.f32 %v964_v10  ;;  %v976_v25 = vand.u32 2147483648, %v964_v10  ;;  %vm970_vm6 = vweird.f32 %v964_v10  ;;  %v974_v27 = vand.u32 2147483647, %v964_v10 }
 0xdc0   :  { %v1008_v9 = vmul.f32 %v1604_v41, %v1007_v46 }
 0xdc1   :  { %v977_v29 = vor.u32 1.1754944e-38, %v976_v25  ;;  %vm975_vm10 = vcmp.eq.f32.partialorder %v974_v27, 8.507059e+37 }
 0xdc2   :  { %v1009_v12 = vadd.f32 %v1604_v41, %v1008_v9 }
 0xdc4   :  { %v1013_v15 = vsel %vm1012_vm3, %v1604_v41, %v1009_v12 }
 0xdc5   :  { %v1018_v17 = vsel %vm1015_vm4, %v1017_v16, %v1013_v15  ;;  %v1608_v19 = vpop.eup %1607  ;;  %vm1142_vm4 = vcmp.eq.s32.totalorder %v1927_v35, 5 }
 0xdc6   :  { %v966_v21 = vmul.f32 %v1608_v19, %v964_v10  ;;  %vm971_vm5 = vweird.f32 %v1608_v19  ;;  %v1024_v52 = vmul.f32 %v1022_v50, %v1018_v17 }
 0xdc7   :  { %vm972_vm9 = vmor %vm970_vm6, %vm971_vm5 }
 0xdc8   :  { %v967_v22 = vsub.f32 1.0, %v966_v21 }
 0xdca   :  { %v968_v23 = vmul.f32 %v1608_v19, %v967_v22 }
 0xdcc   :  { %v969_v24 = vadd.f32 %v1608_v19, %v968_v23 }
 0xdce   :  { %v973_v28 = vsel %vm972_vm9, %v1608_v19, %v969_v24 }
 0xdcf   :  { %v978_v45 = vsel %vm975_vm10, %v977_v29, %v973_v28 }
 0xdd0   :  { %v981_v36 = vmul.f32 %v978_v45, %v2002_v59 }
 0xe0b   :  { %v1027_v18 = vpop.permute.xlu2 %1026 }
 0xe0c   :  { %v1029_v20 = vmul.f32 %v1027_v18, %v1018_v17 }
 0xe0e   :  { %1031 = vrot.lane.b32.xlu0 %v1029_v20, %s1715_s19 }
 0xe22   :  { %v984_v44 = vpop.permute.xlu0 %983 }
 0xe23   :  { %v986_v48 = vmul.f32 %v984_v44, %v978_v45 }
 0xe25   :  { %988 = vrot.lane.b32.xlu1 %v986_v48, %s1715_s19 }
 0xe80   :  { %v1032_v26 = vpop.permute.xlu0 %1031 }
 0xe81   :  { %v2023_v53 = vadd.f32 %v1032_v26, %v1024_v52 }
 0xe83   :  { %1609 = vtanh.f32 %v2023_v53  ;;  %v1166_v44 = vrot.slane %v2023_v53, 7 }
 0xe89   :  { %v1610_v54 = vpop.eup %1609 }
 0xe8a   :  { %1037 = vrot.lane.b32.xlu1 %v1610_v54, %s1714_s0 }
 0xe97   :  { %v989_v57 = vpop.permute.xlu1 %988 }
 0xe98   :  { %v2028_v58 = vadd.f32 %v989_v57, %v981_v36 }
 0xe9a   :  { %1611 = vtanh.f32 %v2028_v58 }
 0xea0   :  { %v1612_v47 = vpop.eup %1611 }
 0xea1   :  { %994 = vrot.lane.b32.xlu2 %v1612_v47, %s1714_s0 }
 0xefb   :  { %v995_v55 = vpop.permute.xlu2 %994 }
 0xefc   :  { %v997_v31 = vmul.f32 %v995_v55, %v978_v45  ;;  %v1038_v30 = vpop.permute.xlu1 %1037 }
 0xefd   :  { %v1040_v32 = vmul.f32 %v1038_v30, %v1018_v17 }
 0xefe   :  { %v999_v61 = vperm.slane %v997_v31, 0  ;;  %v1075_v56 = vrot.slane %v997_v31, 3 }
 0xeff   :  { %v1042_v34 = vrot.slane %v1040_v32, 5  ;;  %1071 = vrot.lane.b32.xlu0 %v1040_v32, %s1715_s19 }
 0xf00   :  { %v2035_v59 = vsel %vm998_vm11, %v999_v61, %v2008_v33  ;;  %1076 = vrot.lane.b32.xlu2 %v1075_v56, %s1714_s0 }
 0xf01   :  { %1043 = vrot.lane.b32.xlu1 %v1042_v34, %s1715_s19 }
 0xf5a   :  { %v1077_v51 = vpop.permute.xlu2 %1076 }
 0xf71   :  { %v1072_v63 = vpop.permute.xlu0 %1071 }
 0xf72   :  { %v1079_v0 = vsel %vm267_vm7, %v1072_v63, %v1077_v51 }
 0xf73   :  { %v1081_v1 = vrot.slane %v1079_v0, 5  ;;  %v1044_v2 = vpop.permute.xlu1 %1043 }
 0xf74   :  { %1479 = vmatmul.msk.f32.vlgmr.msrb.gmra.mxu1 %vm267_vm7, %v1044_v2 }
 0xf75   :  { %1480 = vmatmul.msk.f32.vlgmr.msrb.gmra.mxu2 %vm360_vm8, %v1081_v1 }
 0xff1   :  { %v1064_v3 = vpop.f32.mrf.mxu1 }
 0xff2   :  { %v1068_v62 = vrot.slane %v1064_v3, 2 }
 0xff4   :  { %v1070_v4 = vadd.f32 %v1068_v62, %v1800_v11  ;;  %v2068_v62 = vld [vmem:[#allocation2 + $0x70] sm:$0x1] }
 0xff6   :  { %1613 = vtanh.f32 %v1070_v4  ;;  %v1482_v37 = vmul.f32 -1.442695, %v1070_v4 }
 0xff8   :  { %v1101_v33 = vpop.f32.mrf.mxu2 }
 0xff9   :  { %v1104_v60 = vadd.f32 %v1101_v33, %v1873_v49 }
 0xffb   :  { %1615 = vtanh.f32 %v1104_v60  ;;  %v1481_v41 = vmul.f32 -1.442695, %v1104_v60 }
 0xffc   :  { %v1614_v5 = vpop.eup %1613  ;;  %1617 = vpow2.f32 %v1482_v37 }
 0xffd   :  { %1170 = vrot.lane.b32.xlu2 %v1614_v5, %s1714_s0 }
0x1001   :  { %v1616_v6 = vpop.eup %1615 }
0x1002   :  { %1127 = vrot.lane.b32.xlu0 %v1616_v6, %s1714_s0  ;;  %v1618_v7 = vpop.eup %1617 }
0x1003   :  { %v1148_v38 = vadd.f32 1.0, %v1618_v7 }
0x1005   :  { %1619 = vrcp.f32 %v1148_v38  ;;  %v1160_v8 = vand.u32 2147483648, %v1148_v38  ;;  %vm1154_vm13 = vweird.f32 %v1148_v38  ;;  %v1158_v9 = vand.u32 2147483647, %v1148_v38 }
0x1006   :  { %1621 = vpow2.f32 %v1481_v41 }
0x1007   :  { %v1161_v13 = vor.u32 1.1754944e-38, %v1160_v8  ;;  %vm1159_vm15 = vcmp.eq.f32.partialorder %v1158_v9, 8.507059e+37 }
0x100b   :  { %v1620_v39 = vpop.eup %1619 }
0x100c   :  { %v1150_v40 = vmul.f32 %v1620_v39, %v1148_v38  ;;  %vm1155_vm12 = vweird.f32 %v1620_v39  ;;  %v1622_v49 = vpop.eup %1621 }
0x100d   :  { %vm1156_vm14 = vmor %vm1154_vm13, %vm1155_vm12  ;;  %v1108_v10 = vadd.f32 1.0, %v1622_v49 }
0x100e   :  { %v1151_v42 = vsub.f32 1.0, %v1150_v40 }
0x100f   :  { %1623 = vrcp.f32 %v1108_v10  ;;  %v1120_v22 = vand.u32 2147483648, %v1108_v10  ;;  %vm1114_vm1 = vweird.f32 %v1108_v10  ;;  %v1118_v23 = vand.u32 2147483647, %v1108_v10 }
0x1010   :  { %v1152_v43 = vmul.f32 %v1620_v39, %v1151_v42 }
0x1011   :  { %v1121_v25 = vor.u32 1.1754944e-38, %v1120_v22  ;;  %vm1119_vm3 = vcmp.eq.f32.partialorder %v1118_v23, 8.507059e+37 }
0x1012   :  { %v1153_v46 = vadd.f32 %v1620_v39, %v1152_v43 }
0x1014   :  { %v1157_v12 = vsel %vm1156_vm14, %v1620_v39, %v1153_v46 }
0x1015   :  { %v1162_v14 = vsel %vm1159_vm15, %v1161_v13, %v1157_v12  ;;  %v1624_v17 = vpop.eup %1623  ;;  %vm1286_vm15 = vcmp.eq.s32.totalorder %v1927_v35, 6 }
0x1016   :  { %v1110_v18 = vmul.f32 %v1624_v17, %v1108_v10  ;;  %vm1115_vm0 = vweird.f32 %v1624_v17  ;;  %v1168_v45 = vmul.f32 %v1166_v44, %v1162_v14 }
0x1017   :  { %vm1116_vm2 = vmor %vm1114_vm1, %vm1115_vm0 }
0x1018   :  { %v1111_v19 = vsub.f32 1.0, %v1110_v18 }
0x101a   :  { %v1112_v20 = vmul.f32 %v1624_v17, %v1111_v19 }
0x101c   :  { %v1113_v21 = vadd.f32 %v1624_v17, %v1112_v20 }
0x101e   :  { %v1117_v24 = vsel %vm1116_vm2, %v1624_v17, %v1113_v21 }
0x101f   :  { %v1122_v28 = vsel %vm1119_vm3, %v1121_v25, %v1117_v24  ;;  %vm1401_vm3 = vcmp.eq.s32.totalorder %v1927_v35, 7 }
0x1020   :  { %v1125_v26 = vmul.f32 %v1122_v28, %v2028_v58 }
0x1057   :  { %v1171_v15 = vpop.permute.xlu2 %1170 }
0x1058   :  { %v1173_v16 = vmul.f32 %v1171_v15, %v1162_v14 }
0x105a   :  { %1175 = vrot.lane.b32.xlu0 %v1173_v16, %s1715_s19 }
0x1074   :  { %v1128_v27 = vpop.permute.xlu0 %1127 }
0x1075   :  { %v1130_v29 = vmul.f32 %v1128_v27, %v1122_v28 }
0x1077   :  { %1132 = vrot.lane.b32.xlu1 %v1130_v29, %s1715_s19 }
0x10cc   :  { %v1176_v48 = vpop.permute.xlu0 %1175 }
0x10cd   :  { %v2049_v50 = vadd.f32 %v1176_v48, %v1168_v45 }
0x10cf   :  { %1625 = vtanh.f32 %v2049_v50  ;;  %v1310_v27 = vrot.slane %v2049_v50, 7 }
0x10d5   :  { %v1626_v52 = vpop.eup %1625 }
0x10d6   :  { %1181 = vrot.lane.b32.xlu1 %v1626_v52, %s1714_s0 }
0x10e9   :  { %v1133_v54 = vpop.permute.xlu1 %1132 }
0x10ea   :  { %v2054_v36 = vadd.f32 %v1133_v54, %v1125_v26 }
0x10ec   :  { %1627 = vtanh.f32 %v2054_v36 }
0x10f2   :  { %v1628_v57 = vpop.eup %1627 }
0x10f3   :  { %1138 = vrot.lane.b32.xlu2 %v1628_v57, %s1714_s0 }
0x1148   :  { %v1182_v53 = vpop.permute.xlu1 %1181 }
0x1149   :  { %v1184_v47 = vmul.f32 %v1182_v53, %v1162_v14 }
0x114b   :  { %v1186_v55 = vrot.slane %v1184_v47, 6  ;;  %1215 = vrot.lane.b32.xlu0 %v1184_v47, %s1715_s19 }
0x114d   :  { %1187 = vrot.lane.b32.xlu1 %v1186_v55, %s1715_s19  ;;  %v1139_v31 = vpop.permute.xlu2 %1138 }
0x114e   :  { %v1141_v30 = vmul.f32 %v1139_v31, %v1122_v28 }
0x1150   :  { %v1143_v58 = vperm.slane %v1141_v30, 0  ;;  %v1219_v32 = vrot.slane %v1141_v30, 2 }
0x1152   :  { %1220 = vrot.lane.b32.xlu2 %v1219_v32, %s1714_s0  ;;  %v2063_v61 = vsel %vm1142_vm4, %v1143_v58, %v2035_v59  ;;  %vm1435_vm4 = vcmask 48128  }
0x11ac   :  { %v1221_v56 = vpop.permute.xlu2 %1220 }
0x11bd   :  { %v1216_v34 = vpop.permute.xlu0 %1215 }
0x11be   :  { %v1223_v51 = vsel %vm267_vm7, %v1216_v34, %v1221_v56 }
0x11bf   :  { %v1225_v63 = vrot.slane %v1223_v51, 6  ;;  %v1188_v0 = vpop.permute.xlu1 %1187 }
0x11c0   :  { %1483 = vmatmul.msk.f32.vlgmr.msrb.gmra.mxu0 %vm267_vm7, %v1188_v0 }
0x11c1   :  { %1484 = vmatmul.msk.f32.vlgmr.msra.gmra.mxu1 %vm360_vm8, %v1225_v63 }
0x123d   :  { %v1208_v1 = vpop.f32.mrf.mxu0 }
0x123e   :  { %v1212_v2 = vrot.slane %v1208_v1, 1  ;;  %v1245_v3 = vpop.f32.mrf.mxu1 }
0x123f   :  { %v1248_v4 = vadd.f32 %v2068_v62, %v1245_v3 }
0x1240   :  { %v1214_v59 = vadd.f32 %v1212_v2, %v1800_v11 }
0x1241   :  { %1629 = vtanh.f32 %v1248_v4  ;;  %v1485_v38 = vmul.f32 -1.442695, %v1248_v4 }
0x1242   :  { %1631 = vtanh.f32 %v1214_v59  ;;  %v1486_v5 = vmul.f32 -1.442695, %v1214_v59 }
0x1244   :  { %1633 = vpow2.f32 %v1486_v5 }
0x1247   :  { %v1630_v33 = vpop.eup %1629 }
0x1248   :  { %v1632_v60 = vpop.eup %1631  ;;  %1271 = vrot.lane.b32.xlu0 %v1630_v33, %s1714_s0 }
0x1249   :  { %1314 = vrot.lane.b32.xlu2 %v1632_v60, %s1714_s0 }
0x124a   :  { %v1634_v6 = vpop.eup %1633 }
0x124b   :  { %v1292_v37 = vadd.f32 1.0, %v1634_v6 }
0x124d   :  { %1635 = vrcp.f32 %v1292_v37  ;;  %v1304_v46 = vand.u32 2147483648, %v1292_v37  ;;  %vm1298_vm6 = vweird.f32 %v1292_v37  ;;  %v1302_v49 = vand.u32 2147483647, %v1292_v37 }
0x124e   :  { %1637 = vpow2.f32 %v1485_v38 }
0x124f   :  { %v1305_v9 = vor.u32 1.1754944e-38, %v1304_v46  ;;  %vm1303_vm10 = vcmp.eq.f32.partialorder %v1302_v49, 8.507059e+37  ;;  %v1405_v46 = vld [vmem:[#allocation2 + $0x80] sm:$0xff]  ;;  %v1404_v49 = vld [vmem:[#allocation2 + $0x78] sm:$0xff] }
0x1253   :  { %v1636_v7 = vpop.eup %1635 }
0x1254   :  { %v1294_v39 = vmul.f32 %v1636_v7, %v1292_v37  ;;  %v1638_v41 = vpop.eup %1637  ;;  %vm1299_vm5 = vweird.f32 %v1636_v7 }
0x1255   :  { %v1252_v42 = vadd.f32 1.0, %v1638_v41  ;;  %vm1300_vm9 = vmor %vm1298_vm6, %vm1299_vm5 }
0x1256   :  { %v1295_v40 = vsub.f32 1.0, %v1294_v39 }
0x1257   :  { %1639 = vrcp.f32 %v1252_v42  ;;  %v1264_v19 = vand.u32 2147483648, %v1252_v42  ;;  %vm1258_vm12 = vweird.f32 %v1252_v42  ;;  %v1262_v20 = vand.u32 2147483647, %v1252_v42 }
0x1258   :  { %v1296_v11 = vmul.f32 %v1636_v7, %v1295_v40 }
0x1259   :  { %v1265_v22 = vor.u32 1.1754944e-38, %v1264_v19  ;;  %vm1263_vm14 = vcmp.eq.f32.partialorder %v1262_v20, 8.507059e+37 }
0x125a   :  { %v1297_v43 = vadd.f32 %v1636_v7, %v1296_v11 }
0x125c   :  { %v1301_v8 = vsel %vm1300_vm9, %v1636_v7, %v1297_v43  ;;  %v1406_v43 = vld [vmem:[#allocation2 + $0x88] sm:$0xff] }
0x125d   :  { %v1306_v10 = vsel %vm1303_vm10, %v1305_v9, %v1301_v8  ;;  %v1640_v13 = vpop.eup %1639 }
0x125e   :  { %v1254_v15 = vmul.f32 %v1640_v13, %v1252_v42  ;;  %vm1259_vm11 = vweird.f32 %v1640_v13  ;;  %v1312_v28 = vmul.f32 %v1310_v27, %v1306_v10  ;;  %v1407_v42 = vld [vmem:[#allocation2 + $0x90] sm:$0xff] }
0x125f   :  { %vm1260_vm13 = vmor %vm1258_vm12, %vm1259_vm11  ;;  %1427 = vmatpush.msra.mxu0 %v1407_v42 }
0x1260   :  { %v1255_v16 = vsub.f32 1.0, %v1254_v15 }
0x1261   :  { %1428 = vmatpush.msra.mxu0 %v1406_v43 }
0x1262   :  { %v1256_v17 = vmul.f32 %v1640_v13, %v1255_v16 }
0x1263   :  { %1429 = vmatpush.msra.mxu0 %v1405_v46 }
0x1264   :  { %v1257_v18 = vadd.f32 %v1640_v13, %v1256_v17 }
0x1265   :  { %1430 = vmatpush.msra.mxu0 %v1404_v49 }
0x1266   :  { %v1261_v21 = vsel %vm1260_vm13, %v1640_v13, %v1257_v18 }
0x1267   :  { %v1266_v24 = vsel %vm1263_vm14, %v1265_v22, %v1261_v21 }
0x1268   :  { %v1269_v48 = vmul.f32 %v1266_v24, %v2054_v36 }
0x12a3   :  { %v1315_v12 = vpop.permute.xlu2 %1314 }
0x12a4   :  { %v1317_v14 = vmul.f32 %v1315_v12, %v1306_v10 }
0x12a6   :  { %1319 = vrot.lane.b32.xlu0 %v1317_v14, %s1715_s19  ;;  %v1508_v14 = vld [vmem:[#allocation2 + $0x98] ss:$0 sm:$0xff] }
0x12ba   :  { %v1272_v23 = vpop.permute.xlu0 %1271 }
0x12bb   :  { %v1274_v25 = vmul.f32 %v1272_v23, %v1266_v24 }
0x12bd   :  { %1276 = vrot.lane.b32.xlu1 %v1274_v25, %s1715_s19 }
0x1318   :  { %v1320_v29 = vpop.permute.xlu0 %1319 }
0x1319   :  { %v1322_v44 = vadd.f32 %v1320_v29, %v1312_v28 }
0x131b   :  { %1641 = vtanh.f32 %v1322_v44 }
0x1321   :  { %v1642_v45 = vpop.eup %1641 }
0x1322   :  { %1325 = vrot.lane.b32.xlu1 %v1642_v45, %s1714_s0 }
0x132f   :  { %v1277_v52 = vpop.permute.xlu1 %1276 }
0x1330   :  { %v1279_v26 = vadd.f32 %v1277_v52, %v1269_v48 }
0x1332   :  { %1643 = vtanh.f32 %v1279_v26 }
0x1338   :  { %v1644_v54 = vpop.eup %1643 }
0x1339   :  { %1282 = vrot.lane.b32.xlu2 %v1644_v54, %s1714_s0 }
0x1393   :  { %v1283_v57 = vpop.permute.xlu2 %1282 }
0x1394   :  { %v1285_v53 = vmul.f32 %v1283_v57, %v1266_v24  ;;  %v1326_v47 = vpop.permute.xlu1 %1325 }
0x1395   :  { %v1328_v55 = vmul.f32 %v1326_v47, %v1306_v10 }
0x1396   :  { %v1287_v50 = vperm.slane %v1285_v53, 0  ;;  %v1334_v31 = vrot.slane %v1285_v53, 1 }
0x1397   :  { %1330 = vrot.lane.b32.xlu0 %v1328_v55, %s1715_s19 }
0x1398   :  { %1335 = vrot.lane.b32.xlu2 %v1334_v31, %s1714_s0  ;;  %v1288_v36 = vsel %vm1286_vm15, %v1287_v50, %v2063_v61 }
0x13f2   :  { %v1336_v30 = vpop.permute.xlu2 %1335 }
0x1409   :  { %v1331_v58 = vpop.permute.xlu0 %1330 }
0x140a   :  { %v1338_v32 = vsel %vm267_vm7, %v1331_v58, %v1336_v30 }
0x140b   :  { %v1340_v56 = vrot.slane %v1338_v32, 7 }
0x140d   :  { %1487 = vmatmul.msk.f32.vlgmr.msra.gmra.mxu3 %vm360_vm8, %v1340_v56 }
0x1490   :  { %v1360_v34 = vpop.f32.mrf.mxu3 }
0x1491   :  { %v1363_v51 = vadd.f32 %v2068_v62, %v1360_v34 }
0x1493   :  { %1645 = vtanh.f32 %v1363_v51  ;;  %v1488_v0 = vmul.f32 -1.442695, %v1363_v51 }
0x1495   :  { %1647 = vpow2.f32 %v1488_v0 }
0x1499   :  { %v1646_v63 = vpop.eup %1645 }
0x149a   :  { %1386 = vrot.lane.b32.xlu1 %v1646_v63, %s1714_s0 }
0x149b   :  { %v1648_v1 = vpop.eup %1647 }
0x149c   :  { %v1367_v2 = vadd.f32 1.0, %v1648_v1 }
0x149e   :  { %1649 = vrcp.f32 %v1367_v2  ;;  %v1379_v60 = vand.u32 2147483648, %v1367_v2  ;;  %vm1373_vm8 = vweird.f32 %v1367_v2  ;;  %v1377_v5 = vand.u32 2147483647, %v1367_v2 }
0x14a0   :  { %v1380_v6 = vor.u32 1.1754944e-38, %v1379_v60  ;;  %vm1378_vm2 = vcmp.eq.f32.partialorder %v1377_v5, 8.507059e+37 }
0x14a4   :  { %v1650_v61 = vpop.eup %1649 }
0x14a5   :  { %v1369_v3 = vmul.f32 %v1650_v61, %v1367_v2  ;;  %vm1374_vm0 = vweird.f32 %v1650_v61 }
0x14a6   :  { %vm1375_vm1 = vmor %vm1373_vm8, %vm1374_vm0 }
0x14a7   :  { %v1370_v4 = vsub.f32 1.0, %v1369_v3 }
0x14a9   :  { %v1371_v59 = vmul.f32 %v1650_v61, %v1370_v4 }
0x14ab   :  { %v1372_v33 = vadd.f32 %v1650_v61, %v1371_v59 }
0x14ad   :  { %v1376_v62 = vsel %vm1375_vm1, %v1650_v61, %v1372_v33 }
0x14ae   :  { %v1381_v7 = vsel %vm1378_vm2, %v1380_v6, %v1376_v62 }
0x14af   :  { %v1384_v39 = vmul.f32 %v1381_v7, %v1279_v26 }
0x150c   :  { %v1387_v37 = vpop.permute.xlu1 %1386 }
0x150d   :  { %v1389_v38 = vmul.f32 %v1387_v37, %v1381_v7 }
0x150f   :  { %1391 = vrot.lane.b32.xlu0 %v1389_v38, %s1715_s19 }
0x1581   :  { %v1392_v40 = vpop.permute.xlu0 %1391 }
0x1582   :  { %v1394_v41 = vadd.f32 %v1392_v40, %v1384_v39 }
0x1584   :  { %1651 = vtanh.f32 %v1394_v41 }
0x158a   :  { %v1652_v11 = vpop.eup %1651 }
0x158b   :  { %1397 = vrot.lane.b32.xlu2 %v1652_v11, %s1714_s0 }
0x15e5   :  { %v1398_v8 = vpop.permute.xlu2 %1397 }
0x15e6   :  { %v1400_v9 = vmul.f32 %v1398_v8, %v1381_v7 }
0x15e8   :  { %v1402_v10 = vperm.slane %v1400_v9, 0 }
0x15ea   :  { %v1403_v12 = vsel %vm1401_vm3, %v1402_v10, %v1288_v36 }
0x15eb   :  { %1411 = vrot.lane.b32.xlu1 %v1403_v12, %s1715_s19 }
0x165d   :  { %v1412_v13 = vpop.permute.xlu1 %1411 }
0x165e   :  { %1489 = vmatmul.msk.f32.vlgmr.msra.gmra.mxu0 %vm267_vm7, %v1412_v13 }
0x16db   :  { %v1432_v15 = vpop.f32.mrf.mxu0 }
0x16dc   :  { %v1433_v16 = vadd.f32 %v1508_v14, %v1432_v15 }
0x16de   :  { %1436 = vst.msk [vmem:[#allocation5] sm:$0xff] %vm1435_vm4, %v1433_v16 }
0x16df   :  { %1447 = dma.vmem_to_hbm [thread:$0]  %s1443_s21, 128, %s1445_s24, [#allocation4]  }
0x16e0   :  { %1704 = dma.done.wait [#allocation4], 128  }
0x16e1   :  { %1705 = vsyncadd [#allocation4], 4294967168 }
0x16e2   :  { %1452 = vsyncpa [#allocation3], 1 }
0x16e3   :  { %1453 = vsyncpa [#allocation4], 1 }

</bundles_post_ra>
